<compile_context>
chip_gen: v7x
topology: tpu7x:2x2x1
jax: 0.10.0
libtpu: 0.0.40
codegen_flags: <defaults>
</compile_context>

<pallas_src>
import functools

import jax
import jax.numpy as jnp
from jax.experimental import pallas as pl
from jax.experimental.pallas import tpu as pltpu


# ---------------------------------------------------------------------------
# Kernel 1: fused conv_out + qkv convolution as one GEMM (channel-first)
# ---------------------------------------------------------------------------

def _conv_gemm_kernel(w_ref, x_ref, b_ref, o_ref):
    # w: (Ctot, K) bf16, x: (1, K, L) bf16, b: (Ctot, 1) f32 -> o: (1, Ctot, L) f32
    acc = jnp.dot(w_ref[...], x_ref[0], preferred_element_type=jnp.float32)
    o_ref[0] = acc + b_ref[...]


def fused_conv_gemm(w_all, patches, b_all):
    """(Ctot,K)bf16 @ (N,K,L)bf16 + bias -> (N,Ctot,L)f32, lane-dense outputs."""
    Ctot, K = w_all.shape
    N, K2, L = patches.shape
    assert K == K2
    return pl.pallas_call(
        _conv_gemm_kernel,
        out_shape=jax.ShapeDtypeStruct((N, Ctot, L), jnp.float32),
        grid=(N,),
        in_specs=[
            pl.BlockSpec((Ctot, K), lambda n: (0, 0)),      # full dims -> no padding
            pl.BlockSpec((1, K, L), lambda n: (n, 0, 0)),
            pl.BlockSpec((Ctot, 1), lambda n: (0, 0)),
        ],
        out_specs=pl.BlockSpec((1, Ctot, L), lambda n: (n, 0, 0)),
        compiler_params=pltpu.CompilerParams(
            dimension_semantics=("parallel",),
            vmem_limit_bytes=32 * 1024 * 1024),
    )(w_all, patches, b_all)


# ---------------------------------------------------------------------------
# Kernel 2: multi-head attention + fused 1x1 attn_out projection (channel-first)
# ---------------------------------------------------------------------------

def _attention_kernel(qkv_ref, w1_ref, b1_ref, o_ref, heads_ref, *, dk, dv, Nh, Nb):
    dkh = dk // Nh
    dvh = dv // Nh
    qkv = qkv_ref[...]                      # (Nb, 2dk+dv, L) f32, channels on sublanes
    w1 = w1_ref[...]                        # (dv, dv) f32
    b1 = b1_ref[...]                        # (dv, 1) f32
    for n in range(Nb):                     # static -> fully unrolled, one grid step
        for h in range(Nh):
            q_h = qkv[n, h * dkh:(h + 1) * dkh, :]                     # (dkh, L)
            k_h = qkv[n, dk + h * dkh:dk + (h + 1) * dkh, :]           # (dkh, L)
            v_h = qkv[n, 2 * dk + h * dvh:2 * dk + (h + 1) * dvh, :]   # (dvh, L)
            # logits[l, m] = sum_d q[d, l] * k[d, m]   (scale pre-folded into weights)
            logits = jax.lax.dot_general(
                q_h, k_h, (((0,), (0,)), ((), ())),
                preferred_element_type=jnp.float32)                    # (L, L)
            m = jnp.max(logits, axis=-1, keepdims=True)
            e = jnp.exp(logits - m)
            p = e * pl.reciprocal(jnp.sum(e, axis=-1, keepdims=True), approx=True)
            # head[d, l] = sum_m v[d, m] * p[l, m]
            head = jax.lax.dot_general(
                v_h, p, (((1,), (1,)), ((), ())),
                preferred_element_type=jnp.float32)                    # (dvh, L)
            heads_ref[pl.ds(h * dvh, dvh), :] = head
        # 1x1 attn_out projection hoisted out of the head loop: one (dv,dv)@(dv,L)
        o_ref[n] = jnp.dot(w1, heads_ref[...],
                           preferred_element_type=jnp.float32) + b1


def attention_fused(qkv, w1, b1, *, dk, dv, Nh):
    """qkv: (N, 2dk+dv, L) f32 -> (N, dv, L) f32, attn_out 1x1 conv fused."""
    N, Cq, L = qkv.shape
    kernel = functools.partial(_attention_kernel, dk=dk, dv=dv, Nh=Nh, Nb=N)
    return pl.pallas_call(
        kernel,
        out_shape=jax.ShapeDtypeStruct((N, dv, L), jnp.float32),
        grid=(1,),                                   # whole batch in one block
        in_specs=[
            pl.BlockSpec((N, Cq, L), lambda i: (0, 0, 0)),
            pl.BlockSpec((dv, dv), lambda i: (0, 0)),
            pl.BlockSpec((dv, 1), lambda i: (0, 0)),
        ],
        out_specs=pl.BlockSpec((N, dv, L), lambda i: (0, 0, 0)),
        scratch_shapes=[pltpu.VMEM((dv, L), jnp.float32)],
    )(qkv, w1, b1)


# ---------------------------------------------------------------------------
# Kernel 3: separable align_corners=True bilinear resize (channel-first)
# ---------------------------------------------------------------------------

def _resize_kernel(x_ref, wwT_ref, wh_ref, o_ref, *, tc, H):
    # x: (tc*H, W) bf16; wwT: (W, Wx) bf16; wh: (Hx, H) bf16 -> o: (tc, Hx, Wx) f32
    xw = jnp.dot(x_ref[...], wwT_ref[...],
                 preferred_element_type=jnp.float32)          # (tc*H, Wx) f32
    wh = wh_ref[...]
    for c in range(tc):                                       # static, unrolled
        o_ref[c] = jnp.dot(wh, xw[c * H:(c + 1) * H, :].astype(jnp.bfloat16),
                           preferred_element_type=jnp.float32)


def bilinear_resize_cf(x_cf, Hx, Wx):
    """x_cf: (NC, H, W) -> (NC, Hx, Wx) via two separable GEMMs (no kron matrix)."""
    NC, H, W = x_cf.shape
    tc = 8 if NC % 8 == 0 else NC            # keep the x block (tc*H, W) 8-row aligned
    wh = _interp_matrix(Hx, H).astype(jnp.bfloat16)      # (Hx, H)
    wwT = _interp_matrix(Wx, W).T.astype(jnp.bfloat16)   # (W, Wx)
    x2d = x_cf.reshape(NC * H, W).astype(jnp.bfloat16)   # free reshape + fused cast
    kernel = functools.partial(_resize_kernel, tc=tc, H=H)
    return pl.pallas_call(
        kernel,
        out_shape=jax.ShapeDtypeStruct((NC, Hx, Wx), jnp.float32),
        grid=(NC // tc,),
        in_specs=[
            pl.BlockSpec((tc * H, W), lambda i: (i, 0)),
            pl.BlockSpec((W, Wx), lambda i: (0, 0)),
            pl.BlockSpec((Hx, H), lambda i: (0, 0)),
        ],
        out_specs=pl.BlockSpec((tc, Hx, Wx), lambda i: (i, 0, 0)),
        compiler_params=pltpu.CompilerParams(
            dimension_semantics=("parallel",),
            vmem_limit_bytes=32 * 1024 * 1024),
    )(x2d, wwT, wh)


# ---------------------------------------------------------------------------
# Host-side helpers: transpose-free im2col, 1-D interpolation matrices
# ---------------------------------------------------------------------------

def _im2col_cf(x, k, stride, pad):
    """NCHW -> (N, Cin*k*k, Ho*Wo); channel-first, no transpose."""
    N, C, H, W = x.shape
    Ho = (H + 2 * pad - k) // stride + 1
    Wo = (W + 2 * pad - k) // stride + 1
    xp = jnp.pad(x, ((0, 0), (0, 0), (pad, pad), (pad, pad)))
    cols = []
    for di in range(k):
        for dj in range(k):
            patch = jax.lax.slice(
                xp,
                (0, 0, di, dj),
                (N, C, di + (Ho - 1) * stride + 1, dj + (Wo - 1) * stride + 1),
                (1, 1, stride, stride),
            )  # (N, C, Ho, Wo)
            cols.append(patch)
    cols = jnp.stack(cols, axis=2)                     # (N, C, k*k, Ho, Wo)
    return cols.reshape(N, C * k * k, Ho * Wo), Ho, Wo


def _interp_matrix(n_out, n_in):
    """Row-stochastic matrix for 1-D bilinear interpolation, align_corners=True."""
    if n_out == 1:
        m = jnp.zeros((1, n_in), jnp.float32)
        return m.at[0, 0].set(1.0)
    i = jnp.arange(n_out, dtype=jnp.float32)
    src = i * (n_in - 1) / (n_out - 1)
    p0 = jnp.clip(jnp.floor(src).astype(jnp.int32), 0, n_in - 1)
    p1 = jnp.clip(p0 + 1, 0, n_in - 1)
    frac = src - p0.astype(jnp.float32)
    w0 = jax.nn.one_hot(p0, n_in, dtype=jnp.float32) * (1.0 - frac)[:, None]
    w1 = jax.nn.one_hot(p1, n_in, dtype=jnp.float32) * frac[:, None]
    return w0 + w1


# ---------------------------------------------------------------------------
# Forward pass (3 Pallas kernel launches total, channel-first end to end)
# ---------------------------------------------------------------------------

def augmented_conv_forward(x, params, *, dk, dv, Nh, stride, kernel_size):
    pad = (kernel_size - 1) // 2
    N, _, Hx, Wx = x.shape
    dkh = dk // Nh
    dvh = dv // Nh
    assert dvh == 1, "fused kernel replicates the module's raw reshape only for dvh == 1"

    c_conv = params["conv_out_w"].shape[0]      # out_channels - dv
    c_qkv = params["qkv_w"].shape[0]            # 2*dk + dv

    # (1) transpose-free im2col + ONE fused GEMM for conv_out and qkv_conv.
    patches, H, W = _im2col_cf(x, kernel_size, stride, pad)      # (N, Cin*k*k, L)
    L = H * W
    # fold the q scale (dkh**-0.5) into the qkv weight/bias rows (one-time, host)
    qscale = jnp.concatenate([jnp.full((dk,), dkh ** -0.5, jnp.float32),
                              jnp.ones((dk + dv,), jnp.float32)])
    qkv_w = params["qkv_w"].reshape(c_qkv, -1) * qscale[:, None]
    qkv_b = params["qkv_b"] * qscale
    w_all = jnp.concatenate(
        [params["conv_out_w"].reshape(c_conv, -1), qkv_w],
        axis=0).astype(jnp.bfloat16)                              # (Ctot, Cin*k*k)
    b_all = jnp.concatenate([params["conv_out_b"], qkv_b]).reshape(-1, 1)  # f32
    feat = fused_conv_gemm(w_all, patches.astype(jnp.bfloat16), b_all)     # (N, Ctot, L)

    conv_out = feat[:, :c_conv, :]                                # (N, c_conv, L)
    qkv = feat[:, c_conv:, :]                                     # (N, 2dk+dv, L)

    # (2) fused multi-head attention + attn_out 1x1 projection, channel-first out.
    attn = attention_fused(
        qkv,
        params["attn_out_w"].reshape(dv, dv).astype(jnp.float32),
        params["attn_out_b"].reshape(dv, 1).astype(jnp.float32),
        dk=dk, dv=dv, Nh=Nh)                                      # (N, dv, L)

    # (3) channel concat (no transpose) + separable bilinear resize.
    cat = jnp.concatenate([conv_out, attn], axis=1)               # (N, Cout, L)
    Cout = c_conv + dv
    out = bilinear_resize_cf(cat.reshape(N * Cout, H, W), Hx, Wx)  # (N*Cout, Hx, Wx)
    return out.reshape(N, Cout, Hx, Wx)


# ---------------------------------------------------------------------------
# Pure-JAX reference (for correctness check)
# ---------------------------------------------------------------------------

def reference_forward(x, params, *, dk, dv, Nh, stride, kernel_size):
    pad = (kernel_size - 1) // 2
    N, _, Hx, Wx = x.shape

    def conv(xx, w, b, s, p):
        y = jax.lax.conv_general_dilated(
            xx, w, (s, s), ((p, p), (p, p)),
            dimension_numbers=("NCHW", "OIHW", "NCHW"))
        return y + b[None, :, None, None]

    conv_out = conv(x, params["conv_out_w"], params["conv_out_b"], stride, pad)
    qkv = conv(x, params["qkv_w"], params["qkv_b"], stride, pad)
    _, _, H, W = qkv.shape
    L = H * W
    q, k, v = qkv[:, :dk], qkv[:, dk:2 * dk], qkv[:, 2 * dk:]
    dkh, dvh = dk // Nh, dv // Nh
    flat_q = q.reshape(N, Nh, dkh, L) * (dkh ** -0.5)
    flat_k = k.reshape(N, Nh, dkh, L)
    flat_v = v.reshape(N, Nh, dvh, L)
    logits = jnp.einsum("bndl,bndm->bnlm", flat_q, flat_k)
    wts = jax.nn.softmax(logits, axis=-1)
    attn = jnp.einsum("bnlm,bndm->bnld", wts, flat_v)
    attn = attn.reshape(N, Nh, dvh, H, W).reshape(N, Nh * dvh, H, W)
    attn = conv(attn, params["attn_out_w"], params["attn_out_b"], 1, 0)
    out = jnp.concatenate([conv_out, attn], axis=1)
    wh = _interp_matrix(Hx, H)
    ww = _interp_matrix(Wx, W)
    return jnp.einsum("ip,ncpq,jq->ncij", wh, out, ww)


# ---------------------------------------------------------------------------
# Main
# ---------------------------------------------------------------------------

if __name__ == "__main__":
    in_channels, out_channels = 4, 20
    dk, dv, Nh, stride, ksz = 40, 4, 4, 4, 3

    key = jax.random.PRNGKey(0)
    keys = jax.random.split(key, 7)
    params = {
        "conv_out_w": 0.1 * jax.random.normal(
            keys[0], (out_channels - dv, in_channels, ksz, ksz), jnp.float32),
        "conv_out_b": 0.1 * jax.random.normal(keys[1], (out_channels - dv,), jnp.float32),
        "qkv_w": 0.1 * jax.random.normal(
            keys[2], (2 * dk + dv, in_channels, ksz, ksz), jnp.float32),
        "qkv_b": 0.1 * jax.random.normal(keys[3], (2 * dk + dv,), jnp.float32),
        "attn_out_w": 0.1 * jax.random.normal(keys[4], (dv, dv, 1, 1), jnp.float32),
        "attn_out_b": 0.1 * jax.random.normal(keys[5], (dv,), jnp.float32),
    }
    x = jax.random.normal(keys[6], (2, in_channels, 16, 16), jnp.float32)

    fwd = jax.jit(functools.partial(
        augmented_conv_forward, dk=dk, dv=dv, Nh=Nh, stride=stride, kernel_size=ksz))
    out = jax.block_until_ready(fwd(x, params))

    ref = reference_forward(
        x, params, dk=dk, dv=dv, Nh=Nh, stride=stride, kernel_size=ksz)

    assert out.shape == (2, out_channels, 16, 16), out.shape
    # bf16 MXU operands (conv GEMM + resize GEMMs) with f32 accumulation -> looser tol.
    err = float(jnp.max(jnp.abs(out - ref)))
    assert err < 5e-2, err
    print("KERNEL_OK")
</pallas_src>

<mosaic_0001>
module attributes {stable_mosaic.version = 11 : i64} {
  func.func @_conv_gemm_kernel(%arg0: i32, %arg1: memref<100x36xbf16, #tpu.memory_space<vmem>>, %arg2: memref<1x36x16xbf16, #tpu.memory_space<vmem>>, %arg3: memref<100x1xf32, #tpu.memory_space<vmem>>, %arg4: memref<1x100x16xf32, #tpu.memory_space<vmem>>) attributes {dimension_semantics = [#tpu.dimension_semantics<parallel>], iteration_bounds = array<i64: 2>, scalar_prefetch = 0 : i64, scratch_operands = 0 : i64, tpu.core_type = #tpu.core_type<tc>, window_params = [{pipeline_mode = #tpu.pipeline_mode<synchronous>, transform_indices = @transform_0, window_bounds = array<i64: 100, 36>}, {transform_indices = @transform_1, window_bounds = array<i64: 1, 36, 16>}, {pipeline_mode = #tpu.pipeline_mode<synchronous>, transform_indices = @transform_2, window_bounds = array<i64: 100, 1>}, {transform_indices = @transform_3, window_bounds = array<i64: 1, 100, 16>}]} {
    %c0 = arith.constant 0 : index
    %c0_0 = arith.constant 0 : index
    %0 = vector.load %arg1[%c0, %c0_0] : memref<100x36xbf16, #tpu.memory_space<vmem>>, vector<100x36xbf16>
    %c0_1 = arith.constant 0 : index
    %c0_2 = arith.constant 0 : index
    %c0_3 = arith.constant 0 : index
    %1 = vector.load %arg2[%c0_1, %c0_2, %c0_3] : memref<1x36x16xbf16, #tpu.memory_space<vmem>>, vector<1x36x16xbf16>
    %2 = vector.shape_cast %1 : vector<1x36x16xbf16> to vector<36x16xbf16>
    %cst = arith.constant dense<0.000000e+00> : vector<100x16xf32>
    %3 = tpu.matmul %0, %2, %cst {dimension_numbers = #tpu.dot_dimension_numbers<[1], [0], [0], [1], [0, 0, 1, 1], [], []>} : vector<100x36xbf16>, vector<36x16xbf16>, vector<100x16xf32> -> vector<100x16xf32>
    %c0_4 = arith.constant 0 : index
    %c0_5 = arith.constant 0 : index
    %4 = vector.load %arg3[%c0_4, %c0_5] : memref<100x1xf32, #tpu.memory_space<vmem>>, vector<100x1xf32>
    %5 = vector.broadcast %4 : vector<100x1xf32> to vector<100x16xf32>
    %6 = arith.addf %3, %5 : vector<100x16xf32>
    %c0_6 = arith.constant 0 : index
    %c0_7 = arith.constant 0 : index
    %c0_8 = arith.constant 0 : index
    %7 = vector.load %arg4[%c0_6, %c0_7, %c0_8] : memref<1x100x16xf32, #tpu.memory_space<vmem>>, vector<1x100x16xf32>
    %8 = vector.shape_cast %7 : vector<1x100x16xf32> to vector<100x16xf32>
    %9 = vector.shape_cast %6 : vector<100x16xf32> to vector<1x100x16xf32>
    tpu.vector_store %arg4[%c0_6, %c0_7, %c0_8], %9 {strides = array<i32>} : memref<1x100x16xf32, #tpu.memory_space<vmem>>, vector<1x100x16xf32>,
    return
  }
  func.func @transform_0(%arg0: i32) -> (i32, i32) {
    %c0_i32 = arith.constant 0 : i32
    %c0_i32_0 = arith.constant 0 : i32
    %c0_i32_1 = arith.constant 0 : i32
    return %c0_i32, %c0_i32_0 : i32, i32
  }
  func.func @transform_1(%arg0: i32) -> (i32, i32, i32) {
    %c0_i32 = arith.constant 0 : i32
    %c0_i32_0 = arith.constant 0 : i32
    %c0_i32_1 = arith.constant 0 : i32
    return %arg0, %c0_i32, %c0_i32_0 : i32, i32, i32
  }
  func.func @transform_2(%arg0: i32) -> (i32, i32) {
    %c0_i32 = arith.constant 0 : i32
    %c0_i32_0 = arith.constant 0 : i32
    %c0_i32_1 = arith.constant 0 : i32
    return %c0_i32, %c0_i32_0 : i32, i32
  }
  func.func @transform_3(%arg0: i32) -> (i32, i32, i32) {
    %c0_i32 = arith.constant 0 : i32
    %c0_i32_0 = arith.constant 0 : i32
    %c0_i32_1 = arith.constant 0 : i32
    return %arg0, %c0_i32, %c0_i32_0 : i32, i32, i32
  }
}

module attributes {stable_mosaic.version = 11 : i64} {
  func.func @_attention_kernel(%arg0: i32, %arg1: memref<2x84x16xf32, #tpu.memory_space<vmem>>, %arg2: memref<4x4xf32, #tpu.memory_space<vmem>>, %arg3: memref<4x1xf32, #tpu.memory_space<vmem>>, %arg4: memref<2x4x16xf32, #tpu.memory_space<vmem>>, %arg5: memref<4x16xf32, #tpu.memory_space<vmem>>) attributes {dimension_semantics = [#tpu.dimension_semantics<arbitrary>], iteration_bounds = array<i64: 1>, scalar_prefetch = 0 : i64, scratch_operands = 1 : i64, tpu.core_type = #tpu.core_type<tc>, window_params = [{pipeline_mode = #tpu.pipeline_mode<synchronous>, transform_indices = @transform_0, window_bounds = array<i64: 2, 84, 16>}, {pipeline_mode = #tpu.pipeline_mode<synchronous>, transform_indices = @transform_1, window_bounds = array<i64: 4, 4>}, {pipeline_mode = #tpu.pipeline_mode<synchronous>, transform_indices = @transform_2, window_bounds = array<i64: 4, 1>}, {pipeline_mode = #tpu.pipeline_mode<synchronous>, transform_indices = @transform_3, window_bounds = array<i64: 2, 4, 16>}]} {
    %c0 = arith.constant 0 : index
    %c0_0 = arith.constant 0 : index
    %c0_1 = arith.constant 0 : index
    %0 = vector.load %arg1[%c0, %c0_0, %c0_1] : memref<2x84x16xf32, #tpu.memory_space<vmem>>, vector<2x84x16xf32>
    %c0_2 = arith.constant 0 : index
    %c0_3 = arith.constant 0 : index
    %1 = vector.load %arg2[%c0_2, %c0_3] : memref<4x4xf32, #tpu.memory_space<vmem>>, vector<4x4xf32>
    %c0_4 = arith.constant 0 : index
    %c0_5 = arith.constant 0 : index
    %2 = vector.load %arg3[%c0_4, %c0_5] : memref<4x1xf32, #tpu.memory_space<vmem>>, vector<4x1xf32>
    %3 = vector.extract_strided_slice %0 {offsets = [0, 0, 0], sizes = [1, 10, 16], strides = [1, 1, 1]} : vector<2x84x16xf32> to vector<1x10x16xf32>
    %4 = vector.shape_cast %3 : vector<1x10x16xf32> to vector<10x16xf32>
    %5 = vector.extract_strided_slice %0 {offsets = [0, 40, 0], sizes = [1, 10, 16], strides = [1, 1, 1]} : vector<2x84x16xf32> to vector<1x10x16xf32>
    %6 = vector.shape_cast %5 : vector<1x10x16xf32> to vector<10x16xf32>
    %7 = vector.extract_strided_slice %0 {offsets = [0, 80, 0], sizes = [1, 1, 16], strides = [1, 1, 1]} : vector<2x84x16xf32> to vector<1x1x16xf32>
    %8 = vector.shape_cast %7 : vector<1x1x16xf32> to vector<1x16xf32>
    %cst = arith.constant dense<0.000000e+00> : vector<16x16xf32>
    %9 = tpu.matmul %4, %6, %cst {dimension_numbers = #tpu.dot_dimension_numbers<[0], [0], [1], [1], [0, 1, 1, 1], [], []>} : vector<10x16xf32>, vector<10x16xf32>, vector<16x16xf32> -> vector<16x16xf32>
    %cst_6 = arith.constant dense<0xFF800000> : vector<16xf32>
    %10 = vector.multi_reduction <maximumf>, %9, %cst_6 [1] : vector<16x16xf32> to vector<16xf32>
    %11 = vector.shape_cast %10 : vector<16xf32> to vector<16x1xf32>
    %12 = vector.broadcast %11 : vector<16x1xf32> to vector<16x16xf32>
    %13 = arith.subf %9, %12 : vector<16x16xf32>
    %14 = math.exp %13 : vector<16x16xf32>
    %cst_7 = arith.constant dense<0.000000e+00> : vector<16xf32>
    %15 = vector.multi_reduction <add>, %14, %cst_7 [1] : vector<16x16xf32> to vector<16xf32>
    %16 = vector.shape_cast %15 : vector<16xf32> to vector<16x1xf32>
    %17 = tpu.reciprocal %16 {approx = true} : vector<16x1xf32> -> vector<16x1xf32>
    %18 = vector.broadcast %17 : vector<16x1xf32> to vector<16x16xf32>
    %19 = arith.mulf %14, %18 : vector<16x16xf32>
    %cst_8 = arith.constant dense<0.000000e+00> : vector<1x16xf32>
    %20 = tpu.matmul %8, %19, %cst_8 {dimension_numbers = #tpu.dot_dimension_numbers<[1], [1], [0], [0], [0, 0, 1, 0], [], []>} : vector<1x16xf32>, vector<16x16xf32>, vector<1x16xf32> -> vector<1x16xf32>
    %c0_9 = arith.constant 0 : index
    %c0_10 = arith.constant 0 : index
    %21 = vector.load %arg5[%c0_9, %c0_10] : memref<4x16xf32, #tpu.memory_space<vmem>>, vector<1x16xf32>
    tpu.vector_store %arg5[%c0_9, %c0_10], %20 {strides = array<i32>} : memref<4x16xf32, #tpu.memory_space<vmem>>, vector<1x16xf32>,
    %22 = vector.extract_strided_slice %0 {offsets = [0, 10, 0], sizes = [1, 10, 16], strides = [1, 1, 1]} : vector<2x84x16xf32> to vector<1x10x16xf32>
    %23 = vector.shape_cast %22 : vector<1x10x16xf32> to vector<10x16xf32>
    %24 = vector.extract_strided_slice %0 {offsets = [0, 50, 0], sizes = [1, 10, 16], strides = [1, 1, 1]} : vector<2x84x16xf32> to vector<1x10x16xf32>
    %25 = vector.shape_cast %24 : vector<1x10x16xf32> to vector<10x16xf32>
    %26 = vector.extract_strided_slice %0 {offsets = [0, 81, 0], sizes = [1, 1, 16], strides = [1, 1, 1]} : vector<2x84x16xf32> to vector<1x1x16xf32>
    %27 = vector.shape_cast %26 : vector<1x1x16xf32> to vector<1x16xf32>
    %cst_11 = arith.constant dense<0.000000e+00> : vector<16x16xf32>
    %28 = tpu.matmul %23, %25, %cst_11 {dimension_numbers = #tpu.dot_dimension_numbers<[0], [0], [1], [1], [0, 1, 1, 1], [], []>} : vector<10x16xf32>, vector<10x16xf32>, vector<16x16xf32> -> vector<16x16xf32>
    %cst_12 = arith.constant dense<0xFF800000> : vector<16xf32>
    %29 = vector.multi_reduction <maximumf>, %28, %cst_12 [1] : vector<16x16xf32> to vector<16xf32>
    %30 = vector.shape_cast %29 : vector<16xf32> to vector<16x1xf32>
    %31 = vector.broadcast %30 : vector<16x1xf32> to vector<16x16xf32>
    %32 = arith.subf %28, %31 : vector<16x16xf32>
    %33 = math.exp %32 : vector<16x16xf32>
    %cst_13 = arith.constant dense<0.000000e+00> : vector<16xf32>
    %34 = vector.multi_reduction <add>, %33, %cst_13 [1] : vector<16x16xf32> to vector<16xf32>
    %35 = vector.shape_cast %34 : vector<16xf32> to vector<16x1xf32>
    %36 = tpu.reciprocal %35 {approx = true} : vector<16x1xf32> -> vector<16x1xf32>
    %37 = vector.broadcast %36 : vector<16x1xf32> to vector<16x16xf32>
    %38 = arith.mulf %33, %37 : vector<16x16xf32>
    %cst_14 = arith.constant dense<0.000000e+00> : vector<1x16xf32>
    %39 = tpu.matmul %27, %38, %cst_14 {dimension_numbers = #tpu.dot_dimension_numbers<[1], [1], [0], [0], [0, 0, 1, 0], [], []>} : vector<1x16xf32>, vector<16x16xf32>, vector<1x16xf32> -> vector<1x16xf32>
    %c1 = arith.constant 1 : index
    %c0_15 = arith.constant 0 : index
    %40 = vector.load %arg5[%c1, %c0_15] : memref<4x16xf32, #tpu.memory_space<vmem>>, vector<1x16xf32>
    tpu.vector_store %arg5[%c1, %c0_15], %39 {strides = array<i32>} : memref<4x16xf32, #tpu.memory_space<vmem>>, vector<1x16xf32>,
    %41 = vector.extract_strided_slice %0 {offsets = [0, 20, 0], sizes = [1, 10, 16], strides = [1, 1, 1]} : vector<2x84x16xf32> to vector<1x10x16xf32>
    %42 = vector.shape_cast %41 : vector<1x10x16xf32> to vector<10x16xf32>
    %43 = vector.extract_strided_slice %0 {offsets = [0, 60, 0], sizes = [1, 10, 16], strides = [1, 1, 1]} : vector<2x84x16xf32> to vector<1x10x16xf32>
    %44 = vector.shape_cast %43 : vector<1x10x16xf32> to vector<10x16xf32>
    %45 = vector.extract_strided_slice %0 {offsets = [0, 82, 0], sizes = [1, 1, 16], strides = [1, 1, 1]} : vector<2x84x16xf32> to vector<1x1x16xf32>
    %46 = vector.shape_cast %45 : vector<1x1x16xf32> to vector<1x16xf32>
    %cst_16 = arith.constant dense<0.000000e+00> : vector<16x16xf32>
    %47 = tpu.matmul %42, %44, %cst_16 {dimension_numbers = #tpu.dot_dimension_numbers<[0], [0], [1], [1], [0, 1, 1, 1], [], []>} : vector<10x16xf32>, vector<10x16xf32>, vector<16x16xf32> -> vector<16x16xf32>
    %cst_17 = arith.constant dense<0xFF800000> : vector<16xf32>
    %48 = vector.multi_reduction <maximumf>, %47, %cst_17 [1] : vector<16x16xf32> to vector<16xf32>
    %49 = vector.shape_cast %48 : vector<16xf32> to vector<16x1xf32>
    %50 = vector.broadcast %49 : vector<16x1xf32> to vector<16x16xf32>
    %51 = arith.subf %47, %50 : vector<16x16xf32>
    %52 = math.exp %51 : vector<16x16xf32>
    %cst_18 = arith.constant dense<0.000000e+00> : vector<16xf32>
    %53 = vector.multi_reduction <add>, %52, %cst_18 [1] : vector<16x16xf32> to vector<16xf32>
    %54 = vector.shape_cast %53 : vector<16xf32> to vector<16x1xf32>
    %55 = tpu.reciprocal %54 {approx = true} : vector<16x1xf32> -> vector<16x1xf32>
    %56 = vector.broadcast %55 : vector<16x1xf32> to vector<16x16xf32>
    %57 = arith.mulf %52, %56 : vector<16x16xf32>
    %cst_19 = arith.constant dense<0.000000e+00> : vector<1x16xf32>
    %58 = tpu.matmul %46, %57, %cst_19 {dimension_numbers = #tpu.dot_dimension_numbers<[1], [1], [0], [0], [0, 0, 1, 0], [], []>} : vector<1x16xf32>, vector<16x16xf32>, vector<1x16xf32> -> vector<1x16xf32>
    %c2 = arith.constant 2 : index
    %c0_20 = arith.constant 0 : index
    %59 = vector.load %arg5[%c2, %c0_20] : memref<4x16xf32, #tpu.memory_space<vmem>>, vector<1x16xf32>
    tpu.vector_store %arg5[%c2, %c0_20], %58 {strides = array<i32>} : memref<4x16xf32, #tpu.memory_space<vmem>>, vector<1x16xf32>,
    %60 = vector.extract_strided_slice %0 {offsets = [0, 30, 0], sizes = [1, 10, 16], strides = [1, 1, 1]} : vector<2x84x16xf32> to vector<1x10x16xf32>
    %61 = vector.shape_cast %60 : vector<1x10x16xf32> to vector<10x16xf32>
    %62 = vector.extract_strided_slice %0 {offsets = [0, 70, 0], sizes = [1, 10, 16], strides = [1, 1, 1]} : vector<2x84x16xf32> to vector<1x10x16xf32>
    %63 = vector.shape_cast %62 : vector<1x10x16xf32> to vector<10x16xf32>
    %64 = vector.extract_strided_slice %0 {offsets = [0, 83, 0], sizes = [1, 1, 16], strides = [1, 1, 1]} : vector<2x84x16xf32> to vector<1x1x16xf32>
    %65 = vector.shape_cast %64 : vector<1x1x16xf32> to vector<1x16xf32>
    %cst_21 = arith.constant dense<0.000000e+00> : vector<16x16xf32>
    %66 = tpu.matmul %61, %63, %cst_21 {dimension_numbers = #tpu.dot_dimension_numbers<[0], [0], [1], [1], [0, 1, 1, 1], [], []>} : vector<10x16xf32>, vector<10x16xf32>, vector<16x16xf32> -> vector<16x16xf32>
    %cst_22 = arith.constant dense<0xFF800000> : vector<16xf32>
    %67 = vector.multi_reduction <maximumf>, %66, %cst_22 [1] : vector<16x16xf32> to vector<16xf32>
    %68 = vector.shape_cast %67 : vector<16xf32> to vector<16x1xf32>
    %69 = vector.broadcast %68 : vector<16x1xf32> to vector<16x16xf32>
    %70 = arith.subf %66, %69 : vector<16x16xf32>
    %71 = math.exp %70 : vector<16x16xf32>
    %cst_23 = arith.constant dense<0.000000e+00> : vector<16xf32>
    %72 = vector.multi_reduction <add>, %71, %cst_23 [1] : vector<16x16xf32> to vector<16xf32>
    %73 = vector.shape_cast %72 : vector<16xf32> to vector<16x1xf32>
    %74 = tpu.reciprocal %73 {approx = true} : vector<16x1xf32> -> vector<16x1xf32>
    %75 = vector.broadcast %74 : vector<16x1xf32> to vector<16x16xf32>
    %76 = arith.mulf %71, %75 : vector<16x16xf32>
    %cst_24 = arith.constant dense<0.000000e+00> : vector<1x16xf32>
    %77 = tpu.matmul %65, %76, %cst_24 {dimension_numbers = #tpu.dot_dimension_numbers<[1], [1], [0], [0], [0, 0, 1, 0], [], []>} : vector<1x16xf32>, vector<16x16xf32>, vector<1x16xf32> -> vector<1x16xf32>
    %c3 = arith.constant 3 : index
    %c0_25 = arith.constant 0 : index
    %78 = vector.load %arg5[%c3, %c0_25] : memref<4x16xf32, #tpu.memory_space<vmem>>, vector<1x16xf32>
    tpu.vector_store %arg5[%c3, %c0_25], %77 {strides = array<i32>} : memref<4x16xf32, #tpu.memory_space<vmem>>, vector<1x16xf32>,
    %c0_26 = arith.constant 0 : index
    %c0_27 = arith.constant 0 : index
    %79 = vector.load %arg5[%c0_26, %c0_27] : memref<4x16xf32, #tpu.memory_space<vmem>>, vector<4x16xf32>
    %cst_28 = arith.constant dense<0.000000e+00> : vector<4x16xf32>
    %80 = tpu.matmul %1, %79, %cst_28 {dimension_numbers = #tpu.dot_dimension_numbers<[1], [0], [0], [1], [0, 0, 1, 1], [], []>} : vector<4x4xf32>, vector<4x16xf32>, vector<4x16xf32> -> vector<4x16xf32>
    %81 = vector.broadcast %2 : vector<4x1xf32> to vector<4x16xf32>
    %82 = arith.addf %80, %81 : vector<4x16xf32>
    %c0_29 = arith.constant 0 : index
    %c0_30 = arith.constant 0 : index
    %c0_31 = arith.constant 0 : index
    %83 = vector.load %arg4[%c0_29, %c0_30, %c0_31] : memref<2x4x16xf32, #tpu.memory_space<vmem>>, vector<1x4x16xf32>
    %84 = vector.shape_cast %83 : vector<1x4x16xf32> to vector<4x16xf32>
    %85 = vector.shape_cast %82 : vector<4x16xf32> to vector<1x4x16xf32>
    tpu.vector_store %arg4[%c0_29, %c0_30, %c0_31], %85 {strides = array<i32>} : memref<2x4x16xf32, #tpu.memory_space<vmem>>, vector<1x4x16xf32>,
    %86 = vector.extract_strided_slice %0 {offsets = [1, 0, 0], sizes = [1, 10, 16], strides = [1, 1, 1]} : vector<2x84x16xf32> to vector<1x10x16xf32>
    %87 = vector.shape_cast %86 : vector<1x10x16xf32> to vector<10x16xf32>
    %88 = vector.extract_strided_slice %0 {offsets = [1, 40, 0], sizes = [1, 10, 16], strides = [1, 1, 1]} : vector<2x84x16xf32> to vector<1x10x16xf32>
    %89 = vector.shape_cast %88 : vector<1x10x16xf32> to vector<10x16xf32>
    %90 = vector.extract_strided_slice %0 {offsets = [1, 80, 0], sizes = [1, 1, 16], strides = [1, 1, 1]} : vector<2x84x16xf32> to vector<1x1x16xf32>
    %91 = vector.shape_cast %90 : vector<1x1x16xf32> to vector<1x16xf32>
    %cst_32 = arith.constant dense<0.000000e+00> : vector<16x16xf32>
    %92 = tpu.matmul %87, %89, %cst_32 {dimension_numbers = #tpu.dot_dimension_numbers<[0], [0], [1], [1], [0, 1, 1, 1], [], []>} : vector<10x16xf32>, vector<10x16xf32>, vector<16x16xf32> -> vector<16x16xf32>
    %cst_33 = arith.constant dense<0xFF800000> : vector<16xf32>
    %93 = vector.multi_reduction <maximumf>, %92, %cst_33 [1] : vector<16x16xf32> to vector<16xf32>
    %94 = vector.shape_cast %93 : vector<16xf32> to vector<16x1xf32>
    %95 = vector.broadcast %94 : vector<16x1xf32> to vector<16x16xf32>
    %96 = arith.subf %92, %95 : vector<16x16xf32>
    %97 = math.exp %96 : vector<16x16xf32>
    %cst_34 = arith.constant dense<0.000000e+00> : vector<16xf32>
    %98 = vector.multi_reduction <add>, %97, %cst_34 [1] : vector<16x16xf32> to vector<16xf32>
    %99 = vector.shape_cast %98 : vector<16xf32> to vector<16x1xf32>
    %100 = tpu.reciprocal %99 {approx = true} : vector<16x1xf32> -> vector<16x1xf32>
    %101 = vector.broadcast %100 : vector<16x1xf32> to vector<16x16xf32>
    %102 = arith.mulf %97, %101 : vector<16x16xf32>
    %cst_35 = arith.constant dense<0.000000e+00> : vector<1x16xf32>
    %103 = tpu.matmul %91, %102, %cst_35 {dimension_numbers = #tpu.dot_dimension_numbers<[1], [1], [0], [0], [0, 0, 1, 0], [], []>} : vector<1x16xf32>, vector<16x16xf32>, vector<1x16xf32> -> vector<1x16xf32>
    %c0_36 = arith.constant 0 : index
    %c0_37 = arith.constant 0 : index
    %104 = vector.load %arg5[%c0_36, %c0_37] : memref<4x16xf32, #tpu.memory_space<vmem>>, vector<1x16xf32>
    tpu.vector_store %arg5[%c0_36, %c0_37], %103 {strides = array<i32>} : memref<4x16xf32, #tpu.memory_space<vmem>>, vector<1x16xf32>,
    %105 = vector.extract_strided_slice %0 {offsets = [1, 10, 0], sizes = [1, 10, 16], strides = [1, 1, 1]} : vector<2x84x16xf32> to vector<1x10x16xf32>
    %106 = vector.shape_cast %105 : vector<1x10x16xf32> to vector<10x16xf32>
    %107 = vector.extract_strided_slice %0 {offsets = [1, 50, 0], sizes = [1, 10, 16], strides = [1, 1, 1]} : vector<2x84x16xf32> to vector<1x10x16xf32>
    %108 = vector.shape_cast %107 : vector<1x10x16xf32> to vector<10x16xf32>
    %109 = vector.extract_strided_slice %0 {offsets = [1, 81, 0], sizes = [1, 1, 16], strides = [1, 1, 1]} : vector<2x84x16xf32> to vector<1x1x16xf32>
    %110 = vector.shape_cast %109 : vector<1x1x16xf32> to vector<1x16xf32>
    %cst_38 = arith.constant dense<0.000000e+00> : vector<16x16xf32>
    %111 = tpu.matmul %106, %108, %cst_38 {dimension_numbers = #tpu.dot_dimension_numbers<[0], [0], [1], [1], [0, 1, 1, 1], [], []>} : vector<10x16xf32>, vector<10x16xf32>, vector<16x16xf32> -> vector<16x16xf32>
    %cst_39 = arith.constant dense<0xFF800000> : vector<16xf32>
    %112 = vector.multi_reduction <maximumf>, %111, %cst_39 [1] : vector<16x16xf32> to vector<16xf32>
    %113 = vector.shape_cast %112 : vector<16xf32> to vector<16x1xf32>
    %114 = vector.broadcast %113 : vector<16x1xf32> to vector<16x16xf32>
    %115 = arith.subf %111, %114 : vector<16x16xf32>
    %116 = math.exp %115 : vector<16x16xf32>
    %cst_40 = arith.constant dense<0.000000e+00> : vector<16xf32>
    %117 = vector.multi_reduction <add>, %116, %cst_40 [1] : vector<16x16xf32> to vector<16xf32>
    %118 = vector.shape_cast %117 : vector<16xf32> to vector<16x1xf32>
    %119 = tpu.reciprocal %118 {approx = true} : vector<16x1xf32> -> vector<16x1xf32>
    %120 = vector.broadcast %119 : vector<16x1xf32> to vector<16x16xf32>
    %121 = arith.mulf %116, %120 : vector<16x16xf32>
    %cst_41 = arith.constant dense<0.000000e+00> : vector<1x16xf32>
    %122 = tpu.matmul %110, %121, %cst_41 {dimension_numbers = #tpu.dot_dimension_numbers<[1], [1], [0], [0], [0, 0, 1, 0], [], []>} : vector<1x16xf32>, vector<16x16xf32>, vector<1x16xf32> -> vector<1x16xf32>
    %c1_42 = arith.constant 1 : index
    %c0_43 = arith.constant 0 : index
    %123 = vector.load %arg5[%c1_42, %c0_43] : memref<4x16xf32, #tpu.memory_space<vmem>>, vector<1x16xf32>
    tpu.vector_store %arg5[%c1_42, %c0_43], %122 {strides = array<i32>} : memref<4x16xf32, #tpu.memory_space<vmem>>, vector<1x16xf32>,
    %124 = vector.extract_strided_slice %0 {offsets = [1, 20, 0], sizes = [1, 10, 16], strides = [1, 1, 1]} : vector<2x84x16xf32> to vector<1x10x16xf32>
    %125 = vector.shape_cast %124 : vector<1x10x16xf32> to vector<10x16xf32>
    %126 = vector.extract_strided_slice %0 {offsets = [1, 60, 0], sizes = [1, 10, 16], strides = [1, 1, 1]} : vector<2x84x16xf32> to vector<1x10x16xf32>
    %127 = vector.shape_cast %126 : vector<1x10x16xf32> to vector<10x16xf32>
    %128 = vector.extract_strided_slice %0 {offsets = [1, 82, 0], sizes = [1, 1, 16], strides = [1, 1, 1]} : vector<2x84x16xf32> to vector<1x1x16xf32>
    %129 = vector.shape_cast %128 : vector<1x1x16xf32> to vector<1x16xf32>
    %cst_44 = arith.constant dense<0.000000e+00> : vector<16x16xf32>
    %130 = tpu.matmul %125, %127, %cst_44 {dimension_numbers = #tpu.dot_dimension_numbers<[0], [0], [1], [1], [0, 1, 1, 1], [], []>} : vector<10x16xf32>, vector<10x16xf32>, vector<16x16xf32> -> vector<16x16xf32>
    %cst_45 = arith.constant dense<0xFF800000> : vector<16xf32>
    %131 = vector.multi_reduction <maximumf>, %130, %cst_45 [1] : vector<16x16xf32> to vector<16xf32>
    %132 = vector.shape_cast %131 : vector<16xf32> to vector<16x1xf32>
    %133 = vector.broadcast %132 : vector<16x1xf32> to vector<16x16xf32>
    %134 = arith.subf %130, %133 : vector<16x16xf32>
    %135 = math.exp %134 : vector<16x16xf32>
    %cst_46 = arith.constant dense<0.000000e+00> : vector<16xf32>
    %136 = vector.multi_reduction <add>, %135, %cst_46 [1] : vector<16x16xf32> to vector<16xf32>
    %137 = vector.shape_cast %136 : vector<16xf32> to vector<16x1xf32>
    %138 = tpu.reciprocal %137 {approx = true} : vector<16x1xf32> -> vector<16x1xf32>
    %139 = vector.broadcast %138 : vector<16x1xf32> to vector<16x16xf32>
    %140 = arith.mulf %135, %139 : vector<16x16xf32>
    %cst_47 = arith.constant dense<0.000000e+00> : vector<1x16xf32>
    %141 = tpu.matmul %129, %140, %cst_47 {dimension_numbers = #tpu.dot_dimension_numbers<[1], [1], [0], [0], [0, 0, 1, 0], [], []>} : vector<1x16xf32>, vector<16x16xf32>, vector<1x16xf32> -> vector<1x16xf32>
    %c2_48 = arith.constant 2 : index
    %c0_49 = arith.constant 0 : index
    %142 = vector.load %arg5[%c2_48, %c0_49] : memref<4x16xf32, #tpu.memory_space<vmem>>, vector<1x16xf32>
    tpu.vector_store %arg5[%c2_48, %c0_49], %141 {strides = array<i32>} : memref<4x16xf32, #tpu.memory_space<vmem>>, vector<1x16xf32>,
    %143 = vector.extract_strided_slice %0 {offsets = [1, 30, 0], sizes = [1, 10, 16], strides = [1, 1, 1]} : vector<2x84x16xf32> to vector<1x10x16xf32>
    %144 = vector.shape_cast %143 : vector<1x10x16xf32> to vector<10x16xf32>
    %145 = vector.extract_strided_slice %0 {offsets = [1, 70, 0], sizes = [1, 10, 16], strides = [1, 1, 1]} : vector<2x84x16xf32> to vector<1x10x16xf32>
    %146 = vector.shape_cast %145 : vector<1x10x16xf32> to vector<10x16xf32>
    %147 = vector.extract_strided_slice %0 {offsets = [1, 83, 0], sizes = [1, 1, 16], strides = [1, 1, 1]} : vector<2x84x16xf32> to vector<1x1x16xf32>
    %148 = vector.shape_cast %147 : vector<1x1x16xf32> to vector<1x16xf32>
    %cst_50 = arith.constant dense<0.000000e+00> : vector<16x16xf32>
    %149 = tpu.matmul %144, %146, %cst_50 {dimension_numbers = #tpu.dot_dimension_numbers<[0], [0], [1], [1], [0, 1, 1, 1], [], []>} : vector<10x16xf32>, vector<10x16xf32>, vector<16x16xf32> -> vector<16x16xf32>
    %cst_51 = arith.constant dense<0xFF800000> : vector<16xf32>
    %150 = vector.multi_reduction <maximumf>, %149, %cst_51 [1] : vector<16x16xf32> to vector<16xf32>
    %151 = vector.shape_cast %150 : vector<16xf32> to vector<16x1xf32>
    %152 = vector.broadcast %151 : vector<16x1xf32> to vector<16x16xf32>
    %153 = arith.subf %149, %152 : vector<16x16xf32>
    %154 = math.exp %153 : vector<16x16xf32>
    %cst_52 = arith.constant dense<0.000000e+00> : vector<16xf32>
    %155 = vector.multi_reduction <add>, %154, %cst_52 [1] : vector<16x16xf32> to vector<16xf32>
    %156 = vector.shape_cast %155 : vector<16xf32> to vector<16x1xf32>
    %157 = tpu.reciprocal %156 {approx = true} : vector<16x1xf32> -> vector<16x1xf32>
    %158 = vector.broadcast %157 : vector<16x1xf32> to vector<16x16xf32>
    %159 = arith.mulf %154, %158 : vector<16x16xf32>
    %cst_53 = arith.constant dense<0.000000e+00> : vector<1x16xf32>
    %160 = tpu.matmul %148, %159, %cst_53 {dimension_numbers = #tpu.dot_dimension_numbers<[1], [1], [0], [0], [0, 0, 1, 0], [], []>} : vector<1x16xf32>, vector<16x16xf32>, vector<1x16xf32> -> vector<1x16xf32>
    %c3_54 = arith.constant 3 : index
    %c0_55 = arith.constant 0 : index
    %161 = vector.load %arg5[%c3_54, %c0_55] : memref<4x16xf32, #tpu.memory_space<vmem>>, vector<1x16xf32>
    tpu.vector_store %arg5[%c3_54, %c0_55], %160 {strides = array<i32>} : memref<4x16xf32, #tpu.memory_space<vmem>>, vector<1x16xf32>,
    %c0_56 = arith.constant 0 : index
    %c0_57 = arith.constant 0 : index
    %162 = vector.load %arg5[%c0_56, %c0_57] : memref<4x16xf32, #tpu.memory_space<vmem>>, vector<4x16xf32>
    %cst_58 = arith.constant dense<0.000000e+00> : vector<4x16xf32>
    %163 = tpu.matmul %1, %162, %cst_58 {dimension_numbers = #tpu.dot_dimension_numbers<[1], [0], [0], [1], [0, 0, 1, 1], [], []>} : vector<4x4xf32>, vector<4x16xf32>, vector<4x16xf32> -> vector<4x16xf32>
    %164 = vector.broadcast %2 : vector<4x1xf32> to vector<4x16xf32>
    %165 = arith.addf %163, %164 : vector<4x16xf32>
    %c1_59 = arith.constant 1 : index
    %c0_60 = arith.constant 0 : index
    %c0_61 = arith.constant 0 : index
    %166 = vector.load %arg4[%c1_59, %c0_60, %c0_61] : memref<2x4x16xf32, #tpu.memory_space<vmem>>, vector<1x4x16xf32>
    %167 = vector.shape_cast %166 : vector<1x4x16xf32> to vector<4x16xf32>
    %168 = vector.shape_cast %165 : vector<4x16xf32> to vector<1x4x16xf32>
    tpu.vector_store %arg4[%c1_59, %c0_60, %c0_61], %168 {strides = array<i32>} : memref<2x4x16xf32, #tpu.memory_space<vmem>>, vector<1x4x16xf32>,
    return
  }
  func.func @transform_0(%arg0: i32) -> (i32, i32, i32) {
    %c0_i32 = arith.constant 0 : i32
    %c0_i32_0 = arith.constant 0 : i32
    %c0_i32_1 = arith.constant 0 : i32
    %c0_i32_2 = arith.constant 0 : i32
    return %c0_i32, %c0_i32_0, %c0_i32_1 : i32, i32, i32
  }
  func.func @transform_1(%arg0: i32) -> (i32, i32) {
    %c0_i32 = arith.constant 0 : i32
    %c0_i32_0 = arith.constant 0 : i32
    %c0_i32_1 = arith.constant 0 : i32
    return %c0_i32, %c0_i32_0 : i32, i32
  }
  func.func @transform_2(%arg0: i32) -> (i32, i32) {
    %c0_i32 = arith.constant 0 : i32
    %c0_i32_0 = arith.constant 0 : i32
    %c0_i32_1 = arith.constant 0 : i32
    return %c0_i32, %c0_i32_0 : i32, i32
  }
  func.func @transform_3(%arg0: i32) -> (i32, i32, i32) {
    %c0_i32 = arith.constant 0 : i32
    %c0_i32_0 = arith.constant 0 : i32
    %c0_i32_1 = arith.constant 0 : i32
    %c0_i32_2 = arith.constant 0 : i32
    return %c0_i32, %c0_i32_0, %c0_i32_1 : i32, i32, i32
  }
}

module attributes {stable_mosaic.version = 11 : i64} {
  func.func @_resize_kernel(%arg0: i32, %arg1: memref<32x4xbf16, #tpu.memory_space<vmem>>, %arg2: memref<4x16xbf16, #tpu.memory_space<vmem>>, %arg3: memref<16x4xbf16, #tpu.memory_space<vmem>>, %arg4: memref<8x16x16xf32, #tpu.memory_space<vmem>>) attributes {dimension_semantics = [#tpu.dimension_semantics<parallel>], iteration_bounds = array<i64: 5>, scalar_prefetch = 0 : i64, scratch_operands = 0 : i64, tpu.core_type = #tpu.core_type<tc>, window_params = [{transform_indices = @transform_0, window_bounds = array<i64: 32, 4>}, {pipeline_mode = #tpu.pipeline_mode<synchronous>, transform_indices = @transform_1, window_bounds = array<i64: 4, 16>}, {pipeline_mode = #tpu.pipeline_mode<synchronous>, transform_indices = @transform_2, window_bounds = array<i64: 16, 4>}, {transform_indices = @transform_3, window_bounds = array<i64: 8, 16, 16>}]} {
    %c0 = arith.constant 0 : index
    %c0_0 = arith.constant 0 : index
    %0 = vector.load %arg1[%c0, %c0_0] : memref<32x4xbf16, #tpu.memory_space<vmem>>, vector<32x4xbf16>
    %c0_1 = arith.constant 0 : index
    %c0_2 = arith.constant 0 : index
    %1 = vector.load %arg2[%c0_1, %c0_2] : memref<4x16xbf16, #tpu.memory_space<vmem>>, vector<4x16xbf16>
    %cst = arith.constant dense<0.000000e+00> : vector<32x16xf32>
    %2 = tpu.matmul %0, %1, %cst {dimension_numbers = #tpu.dot_dimension_numbers<[1], [0], [0], [1], [0, 0, 1, 1], [], []>} : vector<32x4xbf16>, vector<4x16xbf16>, vector<32x16xf32> -> vector<32x16xf32>
    %c0_3 = arith.constant 0 : index
    %c0_4 = arith.constant 0 : index
    %3 = vector.load %arg3[%c0_3, %c0_4] : memref<16x4xbf16, #tpu.memory_space<vmem>>, vector<16x4xbf16>
    %4 = vector.extract_strided_slice %2 {offsets = [0, 0], sizes = [4, 16], strides = [1, 1]} : vector<32x16xf32> to vector<4x16xf32>
    %5 = arith.truncf %4 : vector<4x16xf32> to vector<4x16xbf16>
    %cst_5 = arith.constant dense<0.000000e+00> : vector<16x16xf32>
    %6 = tpu.matmul %3, %5, %cst_5 {dimension_numbers = #tpu.dot_dimension_numbers<[1], [0], [0], [1], [0, 0, 1, 1], [], []>} : vector<16x4xbf16>, vector<4x16xbf16>, vector<16x16xf32> -> vector<16x16xf32>
    %c0_6 = arith.constant 0 : index
    %c0_7 = arith.constant 0 : index
    %c0_8 = arith.constant 0 : index
    %7 = vector.load %arg4[%c0_6, %c0_7, %c0_8] : memref<8x16x16xf32, #tpu.memory_space<vmem>>, vector<1x16x16xf32>
    %8 = vector.shape_cast %7 : vector<1x16x16xf32> to vector<16x16xf32>
    %9 = vector.shape_cast %6 : vector<16x16xf32> to vector<1x16x16xf32>
    tpu.vector_store %arg4[%c0_6, %c0_7, %c0_8], %9 {strides = array<i32>} : memref<8x16x16xf32, #tpu.memory_space<vmem>>, vector<1x16x16xf32>,
    %10 = vector.extract_strided_slice %2 {offsets = [4, 0], sizes = [4, 16], strides = [1, 1]} : vector<32x16xf32> to vector<4x16xf32>
    %11 = arith.truncf %10 : vector<4x16xf32> to vector<4x16xbf16>
    %cst_9 = arith.constant dense<0.000000e+00> : vector<16x16xf32>
    %12 = tpu.matmul %3, %11, %cst_9 {dimension_numbers = #tpu.dot_dimension_numbers<[1], [0], [0], [1], [0, 0, 1, 1], [], []>} : vector<16x4xbf16>, vector<4x16xbf16>, vector<16x16xf32> -> vector<16x16xf32>
    %c1 = arith.constant 1 : index
    %c0_10 = arith.constant 0 : index
    %c0_11 = arith.constant 0 : index
    %13 = vector.load %arg4[%c1, %c0_10, %c0_11] : memref<8x16x16xf32, #tpu.memory_space<vmem>>, vector<1x16x16xf32>
    %14 = vector.shape_cast %13 : vector<1x16x16xf32> to vector<16x16xf32>
    %15 = vector.shape_cast %12 : vector<16x16xf32> to vector<1x16x16xf32>
    tpu.vector_store %arg4[%c1, %c0_10, %c0_11], %15 {strides = array<i32>} : memref<8x16x16xf32, #tpu.memory_space<vmem>>, vector<1x16x16xf32>,
    %16 = vector.extract_strided_slice %2 {offsets = [8, 0], sizes = [4, 16], strides = [1, 1]} : vector<32x16xf32> to vector<4x16xf32>
    %17 = arith.truncf %16 : vector<4x16xf32> to vector<4x16xbf16>
    %cst_12 = arith.constant dense<0.000000e+00> : vector<16x16xf32>
    %18 = tpu.matmul %3, %17, %cst_12 {dimension_numbers = #tpu.dot_dimension_numbers<[1], [0], [0], [1], [0, 0, 1, 1], [], []>} : vector<16x4xbf16>, vector<4x16xbf16>, vector<16x16xf32> -> vector<16x16xf32>
    %c2 = arith.constant 2 : index
    %c0_13 = arith.constant 0 : index
    %c0_14 = arith.constant 0 : index
    %19 = vector.load %arg4[%c2, %c0_13, %c0_14] : memref<8x16x16xf32, #tpu.memory_space<vmem>>, vector<1x16x16xf32>
    %20 = vector.shape_cast %19 : vector<1x16x16xf32> to vector<16x16xf32>
    %21 = vector.shape_cast %18 : vector<16x16xf32> to vector<1x16x16xf32>
    tpu.vector_store %arg4[%c2, %c0_13, %c0_14], %21 {strides = array<i32>} : memref<8x16x16xf32, #tpu.memory_space<vmem>>, vector<1x16x16xf32>,
    %22 = vector.extract_strided_slice %2 {offsets = [12, 0], sizes = [4, 16], strides = [1, 1]} : vector<32x16xf32> to vector<4x16xf32>
    %23 = arith.truncf %22 : vector<4x16xf32> to vector<4x16xbf16>
    %cst_15 = arith.constant dense<0.000000e+00> : vector<16x16xf32>
    %24 = tpu.matmul %3, %23, %cst_15 {dimension_numbers = #tpu.dot_dimension_numbers<[1], [0], [0], [1], [0, 0, 1, 1], [], []>} : vector<16x4xbf16>, vector<4x16xbf16>, vector<16x16xf32> -> vector<16x16xf32>
    %c3 = arith.constant 3 : index
    %c0_16 = arith.constant 0 : index
    %c0_17 = arith.constant 0 : index
    %25 = vector.load %arg4[%c3, %c0_16, %c0_17] : memref<8x16x16xf32, #tpu.memory_space<vmem>>, vector<1x16x16xf32>
    %26 = vector.shape_cast %25 : vector<1x16x16xf32> to vector<16x16xf32>
    %27 = vector.shape_cast %24 : vector<16x16xf32> to vector<1x16x16xf32>
    tpu.vector_store %arg4[%c3, %c0_16, %c0_17], %27 {strides = array<i32>} : memref<8x16x16xf32, #tpu.memory_space<vmem>>, vector<1x16x16xf32>,
    %28 = vector.extract_strided_slice %2 {offsets = [16, 0], sizes = [4, 16], strides = [1, 1]} : vector<32x16xf32> to vector<4x16xf32>
    %29 = arith.truncf %28 : vector<4x16xf32> to vector<4x16xbf16>
    %cst_18 = arith.constant dense<0.000000e+00> : vector<16x16xf32>
    %30 = tpu.matmul %3, %29, %cst_18 {dimension_numbers = #tpu.dot_dimension_numbers<[1], [0], [0], [1], [0, 0, 1, 1], [], []>} : vector<16x4xbf16>, vector<4x16xbf16>, vector<16x16xf32> -> vector<16x16xf32>
    %c4 = arith.constant 4 : index
    %c0_19 = arith.constant 0 : index
    %c0_20 = arith.constant 0 : index
    %31 = vector.load %arg4[%c4, %c0_19, %c0_20] : memref<8x16x16xf32, #tpu.memory_space<vmem>>, vector<1x16x16xf32>
    %32 = vector.shape_cast %31 : vector<1x16x16xf32> to vector<16x16xf32>
    %33 = vector.shape_cast %30 : vector<16x16xf32> to vector<1x16x16xf32>
    tpu.vector_store %arg4[%c4, %c0_19, %c0_20], %33 {strides = array<i32>} : memref<8x16x16xf32, #tpu.memory_space<vmem>>, vector<1x16x16xf32>,
    %34 = vector.extract_strided_slice %2 {offsets = [20, 0], sizes = [4, 16], strides = [1, 1]} : vector<32x16xf32> to vector<4x16xf32>
    %35 = arith.truncf %34 : vector<4x16xf32> to vector<4x16xbf16>
    %cst_21 = arith.constant dense<0.000000e+00> : vector<16x16xf32>
    %36 = tpu.matmul %3, %35, %cst_21 {dimension_numbers = #tpu.dot_dimension_numbers<[1], [0], [0], [1], [0, 0, 1, 1], [], []>} : vector<16x4xbf16>, vector<4x16xbf16>, vector<16x16xf32> -> vector<16x16xf32>
    %c5 = arith.constant 5 : index
    %c0_22 = arith.constant 0 : index
    %c0_23 = arith.constant 0 : index
    %37 = vector.load %arg4[%c5, %c0_22, %c0_23] : memref<8x16x16xf32, #tpu.memory_space<vmem>>, vector<1x16x16xf32>
    %38 = vector.shape_cast %37 : vector<1x16x16xf32> to vector<16x16xf32>
    %39 = vector.shape_cast %36 : vector<16x16xf32> to vector<1x16x16xf32>
    tpu.vector_store %arg4[%c5, %c0_22, %c0_23], %39 {strides = array<i32>} : memref<8x16x16xf32, #tpu.memory_space<vmem>>, vector<1x16x16xf32>,
    %40 = vector.extract_strided_slice %2 {offsets = [24, 0], sizes = [4, 16], strides = [1, 1]} : vector<32x16xf32> to vector<4x16xf32>
    %41 = arith.truncf %40 : vector<4x16xf32> to vector<4x16xbf16>
    %cst_24 = arith.constant dense<0.000000e+00> : vector<16x16xf32>
    %42 = tpu.matmul %3, %41, %cst_24 {dimension_numbers = #tpu.dot_dimension_numbers<[1], [0], [0], [1], [0, 0, 1, 1], [], []>} : vector<16x4xbf16>, vector<4x16xbf16>, vector<16x16xf32> -> vector<16x16xf32>
    %c6 = arith.constant 6 : index
    %c0_25 = arith.constant 0 : index
    %c0_26 = arith.constant 0 : index
    %43 = vector.load %arg4[%c6, %c0_25, %c0_26] : memref<8x16x16xf32, #tpu.memory_space<vmem>>, vector<1x16x16xf32>
    %44 = vector.shape_cast %43 : vector<1x16x16xf32> to vector<16x16xf32>
    %45 = vector.shape_cast %42 : vector<16x16xf32> to vector<1x16x16xf32>
    tpu.vector_store %arg4[%c6, %c0_25, %c0_26], %45 {strides = array<i32>} : memref<8x16x16xf32, #tpu.memory_space<vmem>>, vector<1x16x16xf32>,
    %46 = vector.extract_strided_slice %2 {offsets = [28, 0], sizes = [4, 16], strides = [1, 1]} : vector<32x16xf32> to vector<4x16xf32>
    %47 = arith.truncf %46 : vector<4x16xf32> to vector<4x16xbf16>
    %cst_27 = arith.constant dense<0.000000e+00> : vector<16x16xf32>
    %48 = tpu.matmul %3, %47, %cst_27 {dimension_numbers = #tpu.dot_dimension_numbers<[1], [0], [0], [1], [0, 0, 1, 1], [], []>} : vector<16x4xbf16>, vector<4x16xbf16>, vector<16x16xf32> -> vector<16x16xf32>
    %c7 = arith.constant 7 : index
    %c0_28 = arith.constant 0 : index
    %c0_29 = arith.constant 0 : index
    %49 = vector.load %arg4[%c7, %c0_28, %c0_29] : memref<8x16x16xf32, #tpu.memory_space<vmem>>, vector<1x16x16xf32>
    %50 = vector.shape_cast %49 : vector<1x16x16xf32> to vector<16x16xf32>
    %51 = vector.shape_cast %48 : vector<16x16xf32> to vector<1x16x16xf32>
    tpu.vector_store %arg4[%c7, %c0_28, %c0_29], %51 {strides = array<i32>} : memref<8x16x16xf32, #tpu.memory_space<vmem>>, vector<1x16x16xf32>,
    return
  }
  func.func @transform_0(%arg0: i32) -> (i32, i32) {
    %c0_i32 = arith.constant 0 : i32
    %c0_i32_0 = arith.constant 0 : i32
    return %arg0, %c0_i32 : i32, i32
  }
  func.func @transform_1(%arg0: i32) -> (i32, i32) {
    %c0_i32 = arith.constant 0 : i32
    %c0_i32_0 = arith.constant 0 : i32
    %c0_i32_1 = arith.constant 0 : i32
    return %c0_i32, %c0_i32_0 : i32, i32
  }
  func.func @transform_2(%arg0: i32) -> (i32, i32) {
    %c0_i32 = arith.constant 0 : i32
    %c0_i32_0 = arith.constant 0 : i32
    %c0_i32_1 = arith.constant 0 : i32
    return %c0_i32, %c0_i32_0 : i32, i32
  }
  func.func @transform_3(%arg0: i32) -> (i32, i32, i32) {
    %c0_i32 = arith.constant 0 : i32
    %c0_i32_0 = arith.constant 0 : i32
    %c0_i32_1 = arith.constant 0 : i32
    return %arg0, %c0_i32, %c0_i32_0 : i32, i32, i32
  }
}

</mosaic_0001>

<bundles_post_ra>
// kernel: mul.27
= control target key start
LH: loop header
LB: loop body
LE: loop exit
PB: predicated region body
PF: predicated region fallthrough
CT: control target
= control target key end

     0   :  { %s34_s0 = inlined_call_operand.vmem [shape: f32[84], index: 0, kind: input, shape index: {}]   ;;  %s35_s1 = inlined_call_operand.vmem [shape: f32[84], index: 1, kind: input, shape index: {}]   ;;  %s36_s2 = inlined_call_operand.vmem [shape: f32[84], index: 2, kind: output, shape index: {}]  }
   0x1   :  { %v3_v0 = vld [vmem:[%s34_s0] sm:$0x1] }
   0x2   :  { %v4_v1 = vld [vmem:[%s35_s1] sm:$0x1] }
   0x3   :  { %v7_v2 = vmul.f32 %v4_v1, %v3_v0 }
   0x5   :  { %9 = vst [vmem:[%s36_s2] sm:$0x1] %v7_v2 }

// kernel: augmented_conv_forward.3
= control target key start
LH: loop header
LB: loop body
LE: loop exit
PB: predicated region body
PF: predicated region fallthrough
CT: control target
= control target key end

     0   :  { %s632_s12 = smov 0   ;;  %s767_s0 = inlined_call_operand.vmem [shape: bf16[100,36], index: 0, kind: input, shape index: {}]   ;;  %s768_s1 = inlined_call_operand.vmem [shape: bf16[2,36,16], index: 1, kind: input, shape index: {}]   ;;  %s769_s2 = inlined_call_operand.vmem [shape: f32[100,1], index: 2, kind: input, shape index: {}]   ;;  %s770_s3 = inlined_call_operand.vmem [shape: f32[2,100,16], index: 3, kind: output, shape index: {}]  }
   0x1 LB: > { %s500_s13 = sadd.s32 4294967295, %s607_s12   ;;  %p504_p0 = scmp.ge.s32.totalorder %s607_s12, 1  ;;  %s607_s12 = sphi %s632_s12, %s13_s12  }
   0x2   : > { %p137_p1 = scmp.lt.s32.totalorder %s607_s12, 3 }
   0x4   : > { %p138_p2 = pnand %p504_p0, %p137_p1 }
   0x5   : > { %p161_p3 = scmp.lt.s32.totalorder (!%p138_p2), %s500_s13, 1  ;;  %v609_v0 = vmov (!%p138_p2), 0.0   ;;  %vm610_vm0 = vmmov (!%p138_p2), 0   ;;  %v611_v1 = vmov (!%p138_p2), 0   ;;  %v190_v4 = vld [vmem:[%s769_s2] sm:$0xff] (!%p138_p2)  ;;  %v192_v6 = vld [vmem:[%s769_s2 + $0x10] sm:$0xff] (!%p138_p2) }
   0x6   : > { %141 = sbr.rel (%p138_p2) target bundleno = 270 (0x10e), region = 32  ;;  %536 = vmatprep.subr.bf16.mxu0 (!%p138_p2), %v609_v0  ;;  %570 = vmatprep.subr.bf16.mxu1 (!%p138_p2), %v609_v0  ;;  %vm338_vm1 = vcmask (!%p138_p2), 1041408   ;;  %v191_v7 = vld [vmem:[%s769_s2 + $0x8] sm:$0xff] (!%p138_p2)  ;;  %v193_v8 = vld [vmem:[%s769_s2 + $0x18] sm:$0xff] (!%p138_p2)  ;;  %v594_v10 = vld [vmem:[%s767_s0] sm:$0xff] (!%p138_p2)   ;;  %vm316_vm2 = vcmask (!%p138_p2), 293888  }
   0x7   : > { %542 = vmatprep.mubr.msk.bf16.mxu0 (!%p138_p2), %vm610_vm0, %v609_v0  ;;  %558 = vmatprep.mubr.msk.bf16.mxu1 (!%p138_p2), %vm610_vm0, %v609_v0  ;;  %v595_v11 = vld [vmem:[%s767_s0 + $0x20] sm:$0xff] (!%p138_p2)   ;;  %v195_v13 = vld [vmem:[%s769_s2 + $0x28] sm:$0xff] (!%p138_p2)  ;;  %v196_v14 = vld [vmem:[%s769_s2 + $0x30] sm:$0xff] (!%p138_p2)  ;;  %vm430_vm3 = vcmask (!%p138_p2), 130048   ;;  %vm443_vm4 = vcmask (!%p138_p2), 125952  }
   0x8   : > { %589 = vset.pattern.permute.xlu0 (!%p138_p2), %v611_v1  ;;  %590 = vset.pattern.permute.xlu1 (!%p138_p2), %v611_v1  ;;  %v194_v12 = vld [vmem:[%s769_s2 + $0x20] sm:$0xff] (!%p138_p2)  ;;  %v197_v15 = vld [vmem:[%s769_s2 + $0x38] sm:$0xff] (!%p138_p2)  ;;  %v596_v16 = vld [vmem:[%s767_s0 + $0x8] sm:$0xff] (!%p138_p2)  }
   0x9   : > { %205 = vperm.xlu0 (!%p138_p2), %589, %v190_v4   ;;  %215 = vperm.xlu1 (!%p138_p2), %590, %v192_v6   ;;  %v597_v17 = vld [vmem:[%s767_s0 + $0x28] sm:$0xff] (!%p138_p2)   ;;  %v198_v18 = vld [vmem:[%s769_s2 + $0x40] sm:$0xff] (!%p138_p2)  ;;  %v200_v20 = vld [vmem:[%s769_s2 + $0x50] sm:$0xff] (!%p138_p2) }
   0xa   : > { %v199_v19 = vld [vmem:[%s769_s2 + $0x48] sm:$0xff] (!%p138_p2)  ;;  %v201_v21 = vld [vmem:[%s769_s2 + $0x58] sm:$0xff] (!%p138_p2)  ;;  %v598_v22 = vld [vmem:[%s767_s0 + $0x10] sm:$0xff] (!%p138_p2)  }
   0xb   : > { %v599_v23 = vld [vmem:[%s767_s0 + $0x30] ss:$0 sps:$4 sm:$0x33] (!%p138_p2)   ;;  %v202_v24 = vld [vmem:[%s769_s2 + $0x60] sm:$0xf] (!%p138_p2)  ;;  %v600_v25 = vld [vmem:[%s767_s0 + $0x18] sm:$0xff] (!%p138_p2)  }
   0xd   : > { %s772_s13 = smov (!%p161_p3, %s500_s13), 1  ;;  %210 = vperm.xlu0 %589, %v191_v7   ;;  %220 = vperm.xlu1 %590, %v193_v8  }
   0xe   : > { %s576_s14 = smul.u32 20, %s772_s13 }
   0xf   : > { %s577_s6 = smul.u32 104, %s772_s13 }
  0x10   : > { %s165_s17 = scalar_lea.vmem %s768_s1, %s576_s14 }
  0x11   : > { %v591_v2 = vld [vmem:[%s165_s17] sm:$0xff]   ;;  %v592_v3 = vld [vmem:[%s165_s17 + $0x8] sm:$0xff]   ;;  %v593_v5 = vld [vmem:[%s165_s17 + $0x10] ss:$0 sps:$4 sm:$0x33]   ;;  %225 = vperm.xlu0 %589, %v194_v12   ;;  %230 = vperm.xlu1 %590, %v195_v13   ;;  %s737_s9 = scalar_lea.vmem %s770_s3, %s577_s6 }
  0x12   : > { %537 = vmatpush3.bf16.msra.mxu0 %v591_v2  ;;  %573 = vmatpush3.bf16.msra.mxu1 %v591_v2  ;;  %v340_v9 = vsel %vm338_vm1, %v593_v5, 0 }
  0x13   : > { %538 = vmatprep.subr.bf16.mxu0 %v609_v0  ;;  %571 = vmatprep.subr.bf16.mxu1 %v609_v0 }
  0x15   : > { %235 = vperm.xlu0 %589, %v196_v14   ;;  %240 = vperm.xlu1 %590, %v197_v15  }
  0x16   : > { %539 = vmatpush3.bf16.msra.mxu0 %v592_v3  ;;  %574 = vmatpush3.bf16.msra.mxu1 %v592_v3 }
  0x17   : > { %540 = vmatprep.subr.bf16.mxu0 %v609_v0  ;;  %572 = vmatprep.subr.bf16.mxu1 %v609_v0 }
  0x19   : > { %245 = vperm.xlu0 %589, %v198_v18   ;;  %250 = vperm.xlu1 %590, %v199_v19  }
  0x1a   : > { %541 = vmatpush3.bf16.msra.mxu0 %v340_v9  ;;  %575 = vmatpush3.bf16.msra.mxu1 %v340_v9 }
  0x1d   : > { %543 = vmatmul.mubr.msk.bf16.vlgmr.msra.gmra.mrb[0].mxu0 %vm316_vm2, %v594_v10  ;;  %559 = vmatmul.mubr.msk.bf16.vlgmr.msra.gmra.mrb[0].mxu1 %vm316_vm2, %v595_v11 }
  0x1e   : > { %546 = vmatprep.mubr.msk.bf16.mxu0 %vm610_vm0, %v609_v0  ;;  %562 = vmatprep.mubr.msk.bf16.mxu1 %vm610_vm0, %v609_v0 }
  0x1f   : > { %255 = vperm.xlu0 %589, %v200_v20   ;;  %260 = vperm.xlu1 %590, %v201_v21  }
  0x23   : > { %265 = vperm.xlu0 %589, %v202_v24  }
  0x25   : > { %547 = vmatmul.mubr.msk.bf16.gmra.mrb[4].mxu0 %vm316_vm2, %v596_v16  ;;  %563 = vmatmul.mubr.msk.bf16.gmra.mrb[4].mxu1 %vm316_vm2, %v597_v17 }
  0x26   : > { %550 = vmatprep.mubr.msk.bf16.mxu0 %vm610_vm0, %v609_v0  ;;  %566 = vmatprep.mubr.msk.bf16.mxu1 %vm610_vm0, %v609_v0 }
  0x2d   : > { %551 = vmatmul.mubr.msk.bf16.gmra.mrb[8].mxu0 %vm316_vm2, %v598_v22  ;;  %567 = vmatmul.mubr.msk.bf16.gmra.mrb[8].mxu1 %vm316_vm2, %v599_v23 }
  0x2e   : > { %554 = vmatprep.mubr.msk.bf16.mxu0 %vm610_vm0, %v609_v0 }
  0x35   : > { %555 = vmatmul.mubr.msk.bf16.gmra.mrb[12].mxu0 %vm316_vm2, %v600_v25 }
  0x88   : > { %v206_v26 = vpop.permute.xlu0 %205  ;;  %v216_v27 = vpop.permute.xlu1 %215 }
  0x8c   : > { %v211_v28 = vpop.permute.xlu0 %210  ;;  %v221_v29 = vpop.permute.xlu1 %220 }
  0x90   : > { %v226_v30 = vpop.permute.xlu0 %225  ;;  %v231_v31 = vpop.permute.xlu1 %230 }
  0x94   : > { %v236_v32 = vpop.permute.xlu0 %235  ;;  %v241_v33 = vpop.permute.xlu1 %240 }
  0x98   : > { %v246_v34 = vpop.permute.xlu0 %245  ;;  %v251_v35 = vpop.permute.xlu1 %250 }
  0x9e   : > { %v256_v48 = vpop.permute.xlu0 %255  ;;  %v261_v49 = vpop.permute.xlu1 %260 }
  0xa2   : > { %v266_v62 = vpop.permute.xlu0 %265 }
  0xf0   : > { %v376_v36 = vpop.f32.mrb[0].mxu0  ;;  %v408_v37 = vpop.f32.mrb[0].mxu1 }
  0xf1   : > { %v377_v38 = vadd.f32 %v376_v36, %v206_v26  ;;  %v544_v39 = vpop.f32.mrb[1].mxu0  ;;  %v409_v40 = vadd.f32 %v408_v37, %v246_v34  ;;  %v560_v41 = vpop.f32.mrb[1].mxu1 }
  0xf2   : > { %v379_v42 = vpop.f32.mrb[2].mxu0  ;;  %v411_v43 = vpop.f32.mrb[2].mxu1 }
  0xf3   : > { %431 = vst.msk [vmem:[%s737_s9] sm:$0xff] %vm430_vm3, %v377_v38  ;;  %v380_v44 = vadd.f32 %v379_v42, %v211_v28  ;;  %439 = vst.msk [vmem:[%s737_s9 + $0x40] sm:$0xff] %vm430_vm3, %v409_v40  ;;  %v545_v45 = vpop.f32.mrb[3].mxu0  ;;  %v412_v46 = vadd.f32 %v411_v43, %v251_v35  ;;  %v561_v47 = vpop.f32.mrb[3].mxu1 }
  0xf5   : > { %432 = vst.msk [vmem:[%s737_s9 + $0x8] sm:$0xff] %vm430_vm3, %v380_v44  ;;  %440 = vst.msk [vmem:[%s737_s9 + $0x48] sm:$0xff] %vm430_vm3, %v412_v46 }
  0xf8   : > { %v384_v50 = vpop.f32.mrb[4].mxu0  ;;  %v416_v51 = vpop.f32.mrb[4].mxu1 }
  0xf9   : > { %v385_v52 = vadd.f32 %v384_v50, %v216_v27  ;;  %v417_v53 = vadd.f32 %v416_v51, %v256_v48  ;;  %v548_v54 = vpop.f32.mrb[5].mxu0  ;;  %v564_v55 = vpop.f32.mrb[5].mxu1 }
  0xfa   : > { %v387_v56 = vpop.f32.mrb[6].mxu0  ;;  %v419_v57 = vpop.f32.mrb[6].mxu1 }
  0xfb   : > { %433 = vst.msk [vmem:[%s737_s9 + $0x10] sm:$0xff] %vm430_vm3, %v385_v52  ;;  %441 = vst.msk [vmem:[%s737_s9 + $0x50] sm:$0xff] %vm430_vm3, %v417_v53  ;;  %v388_v58 = vadd.f32 %v387_v56, %v221_v29  ;;  %v420_v59 = vadd.f32 %v419_v57, %v261_v49  ;;  %v549_v60 = vpop.f32.mrb[7].mxu0  ;;  %v565_v61 = vpop.f32.mrb[7].mxu1 }
  0xfd   : > { %434 = vst.msk [vmem:[%s737_s9 + $0x18] sm:$0xff] %vm430_vm3, %v388_v58  ;;  %442 = vst.msk [vmem:[%s737_s9 + $0x58] sm:$0xff] %vm430_vm3, %v420_v59 }
 0x100   : > { %v392_v63 = vpop.f32.mrb[8].mxu0  ;;  %v424_v0 = vpop.f32.mrb[8].mxu1 }
 0x101   : > { %v393_v1 = vadd.f32 %v392_v63, %v226_v30  ;;  %v425_v2 = vadd.f32 %v424_v0, %v266_v62  ;;  %v552_v3 = vpop.f32.mrb[9].mxu0  ;;  %v568_v4 = vpop.f32.mrb[9].mxu1 }
 0x102   : > { %v395_v5 = vpop.f32.mrb[10].mxu0  ;;  %v427_v6 = vpop.f32.mrb[10].mxu1 }
 0x103   : > { %435 = vst.msk [vmem:[%s737_s9 + $0x20] sm:$0xff] %vm430_vm3, %v393_v1  ;;  %v396_v7 = vadd.f32 %v395_v5, %v231_v31  ;;  %v553_v8 = vpop.f32.mrb[11].mxu0  ;;  %v569_v9 = vpop.f32.mrb[11].mxu1 }
 0x104   : > { %444 = vst.msk [vmem:[%s737_s9 + $0x60] sm:$0xf] %vm443_vm4, %v425_v2 }
 0x105   : > { %436 = vst.msk [vmem:[%s737_s9 + $0x28] sm:$0xff] %vm430_vm3, %v396_v7 }
 0x108   : > { %v400_v10 = vpop.f32.mrb[12].mxu0 }
 0x109   : > { %v401_v11 = vadd.f32 %v400_v10, %v236_v32  ;;  %v556_v12 = vpop.f32.mrb[13].mxu0 }
 0x10a   : > { %v403_v13 = vpop.f32.mrb[14].mxu0 }
 0x10b   : > { %437 = vst.msk [vmem:[%s737_s9 + $0x30] sm:$0xff] %vm430_vm3, %v401_v11  ;;  %v404_v14 = vadd.f32 %v403_v13, %v241_v33  ;;  %v557_v15 = vpop.f32.mrb[15].mxu0 }
 0x10d   : > { %438 = vst.msk [vmem:[%s737_s9 + $0x38] sm:$0xff] %vm430_vm3, %v404_v14 }
 0x10e PF: > { %s13_s12 = sadd.s32 1, %s607_s12  }
 0x10f   : > { %p10_p4 = scmp.ge.s32.totalorder %s13_s12, 4  }
 0x111   :  { %12 = sbr.rel (!%p10_p4) target bundleno = 1 (0x1), region = 62 }

// kernel: augmented_conv_forward.5
= control target key start
LH: loop header
LB: loop body
LE: loop exit
PB: predicated region body
PF: predicated region fallthrough
CT: control target
= control target key end

     0   :  { %s865_s12 = smov 0   ;;  %s954_s0 = inlined_call_operand.vmem [shape: bf16[160,4], index: 0, kind: input, shape index: {}]   ;;  %s955_s1 = inlined_call_operand.vmem [shape: bf16[4,16], index: 1, kind: input, shape index: {}]   ;;  %s956_s2 = inlined_call_operand.vmem [shape: bf16[16,4], index: 2, kind: input, shape index: {}]   ;;  %s957_s3 = inlined_call_operand.vmem [shape: f32[40,16,16], index: 3, kind: output, shape index: {}]  }
   0x1 LB: > { %s708_s13 = sadd.s32 4294967295, %s841_s12   ;;  %p712_p0 = scmp.ge.s32.totalorder %s841_s12, 1  ;;  %s841_s12 = sphi %s865_s12, %s13_s12  }
   0x2   : > { %p138_p1 = scmp.lt.s32.totalorder %s841_s12, 6 }
   0x4   : > { %p139_p2 = pnand %p712_p0, %p138_p1 }
   0x5   : > { %v181_v0 = vld [vmem:[%s955_s1] sm:$0x3] (!%p139_p2)  ;;  %vm199_vm0 = vcmask (!%p139_p2), 1041408   ;;  %s713_s16 = sshll.u32 (!%p139_p2), %s708_s13, 2  ;;  %vm192_vm1 = vcmask (!%p139_p2), 31744   ;;  %v843_v4 = vmov (!%p139_p2), 0.0  }
   0x6   : > { %142 = sbr.rel (%p139_p2) target bundleno = 478 (0x1de), region = 32  ;;  %821 = vmatprep.subr.msk.bf16.mxu0 (!%p139_p2), %vm199_vm0, %v181_v0  ;;  %v201_v1 = vsel (!%p139_p2), %vm199_vm0, %v181_v0, 0  ;;  %p164_p3 = scmp.lt.s32.totalorder (!%p139_p2), %s713_s16, 19  ;;  %773 = vmatprep.subr.bf16.mxu1 (!%p139_p2), %v843_v4  ;;  %vm844_vm2 = vmmov (!%p139_p2), 0   ;;  %v834_v13 = vld [vmem:[%s956_s2] sm:$0xff] (!%p139_p2)   ;;  %vm307_vm3 = vcmask (!%p139_p2), 130048  }
   0x7   : > { %768 = vmatpush3.bf16.msra.mxu0 (!%p139_p2), %v201_v1  ;;  %775 = vmatprep.mubr.msk.bf16.mxu1 (!%p139_p2), %vm844_vm2, %v843_v4  ;;  %s715_s23 = sshll.u32 (!%p139_p2), %s708_s13, 3 }
   0x8   : > { %779 = vmatprep.subr.bf16.mxu0 (!%p139_p2), %v843_v4  ;;  %p170_p4 = scmp.lt.s32.totalorder (!%p139_p2), %s715_s23, 39 }
   0xd   : > { %s959_s16 = smov (!%p164_p3, %s713_s16), 19  ;;  %s961_s23 = smov (!%p170_p4, %s715_s23), 39 }
   0xe   : > { %s714_s17 = sshll.u32 %s959_s16, 2  ;;  %s747_s24 = sshll.u32 %s961_s23, 4 }
   0xf   : > { %s167_s20 = scalar_lea.vmem %s954_s0, %s714_s17  ;;  %s917_s27 = scalar_lea.vmem %s957_s3, %s747_s24 }
  0x10   : > { %v832_v2 = vld [vmem:[%s167_s20] sm:$0xff]   ;;  %v833_v3 = vld [vmem:[%s167_s20 + $0x8] sm:$0xff]  }
  0x11   : > { %769 = vmatprep.mubr.msk.bf16.mxu0 %vm192_vm1, %v832_v2 }
  0x12   : > { %770 = vmatmul.mubr.msk.bf16.vlgmr.msra.gmra.mrb[0].mxu0 %vm192_vm1, %v833_v3 }
  0x13   : > { %781 = vmatprep.mubr.msk.bf16.mxu0 %vm844_vm2, %v843_v4 }
  0xe5   : > { %v771_v5 = vpop.f32.mrb[0].mxu0 }
  0xe6   : > { %v237_v6 = vpop.f32.mrb[1].mxu0  ;;  %v456_v17 = vpack.c.bf16 %v771_v5, %v771_v5 }
  0xe7   : > { %v254_v7 = vpack.c.bf16 %v237_v6, %v237_v6  ;;  %v772_v8 = vpop.f32.mrb[2].mxu0 }
  0xe8   : > { %v240_v9 = vpop.f32.mrb[3].mxu0  ;;  %v505_v19 = vrot.slane %v456_v17, 2  ;;  %v458_v20 = vsel %vm199_vm0, %v456_v17, 0  ;;  %v553_v21 = vpack.c.bf16 %v772_v8, %v772_v8 }
  0xe9   : > { %v311_v10 = vrot.slane %v254_v7, 2  ;;  %v359_v11 = vpack.c.bf16 %v240_v9, %v240_v9  ;;  %v264_v12 = vsel %vm199_vm0, %v254_v7, 0 }
  0xea   : > { %774 = vmatpush3.bf16.msra.mxu1 %v264_v12  ;;  %v507_v22 = vsel %vm199_vm0, %v505_v19, 0  ;;  %v602_v23 = vrot.slane %v553_v21, 2  ;;  %v555_v24 = vsel %vm199_vm0, %v553_v21, 0 }
  0xeb   : > { %v408_v14 = vrot.slane %v359_v11, 2  ;;  %v313_v15 = vsel %vm199_vm0, %v311_v10, 0  ;;  %785 = vmatprep.subr.bf16.mxu1 %v843_v4  ;;  %v361_v16 = vsel %vm199_vm0, %v359_v11, 0 }
  0xec   : > { %780 = vmatpush3.bf16.msra.mxu0 %v313_v15  ;;  %v604_v25 = vsel %vm199_vm0, %v602_v23, 0 }
  0xed   : > { %776 = vmatmul.mubr.msk.bf16.vlgmr.msra.gmra.mrb[0].mxu1 %vm192_vm1, %v834_v13  ;;  %791 = vmatprep.subr.bf16.mxu0 %v843_v4  ;;  %v410_v18 = vsel %vm199_vm0, %v408_v14, 0 }
  0xee   : > { %786 = vmatpush3.bf16.msra.mxu1 %v361_v16  ;;  %787 = vmatprep.mubr.msk.bf16.mxu1 %vm844_vm2, %v843_v4 }
  0xef   : > { %782 = vmatmul.mubr.msk.bf16.vlgmr.msra.gmra.mrb[4].mxu0 %vm192_vm1, %v834_v13  ;;  %797 = vmatprep.subr.bf16.mxu1 %v843_v4 }
  0xf0   : > { %792 = vmatpush3.bf16.msra.mxu0 %v410_v18  ;;  %793 = vmatprep.mubr.msk.bf16.mxu0 %vm844_vm2, %v843_v4 }
  0xf1   : > { %803 = vmatprep.subr.bf16.mxu0 %v843_v4 }
  0xf5   : > { %788 = vmatmul.mubr.msk.bf16.vlgmr.msra.gmra.mrb[4].mxu1 %vm192_vm1, %v834_v13 }
  0xf6   : > { %798 = vmatpush3.bf16.msra.mxu1 %v458_v20  ;;  %799 = vmatprep.mubr.msk.bf16.mxu1 %vm844_vm2, %v843_v4 }
  0xf7   : > { %794 = vmatmul.mubr.msk.bf16.vlgmr.msra.gmra.mrb[8].mxu0 %vm192_vm1, %v834_v13  ;;  %809 = vmatprep.subr.bf16.mxu1 %v843_v4 }
  0xf8   : > { %804 = vmatpush3.bf16.msra.mxu0 %v507_v22  ;;  %805 = vmatprep.mubr.msk.bf16.mxu0 %vm844_vm2, %v843_v4 }
  0xf9   : > { %815 = vmatprep.subr.bf16.mxu0 %v843_v4 }
  0xfd   : > { %800 = vmatmul.mubr.msk.bf16.vlgmr.msra.gmra.mrb[8].mxu1 %vm192_vm1, %v834_v13 }
  0xfe   : > { %810 = vmatpush3.bf16.msra.mxu1 %v555_v24  ;;  %811 = vmatprep.mubr.msk.bf16.mxu1 %vm844_vm2, %v843_v4 }
  0xff   : > { %806 = vmatmul.mubr.msk.bf16.vlgmr.msra.gmra.mrb[12].mxu0 %vm192_vm1, %v834_v13 }
 0x100   : > { %816 = vmatpush3.bf16.msra.mxu0 %v604_v25  ;;  %817 = vmatprep.mubr.msk.bf16.mxu0 %vm844_vm2, %v843_v4 }
 0x105   : > { %812 = vmatmul.mubr.msk.bf16.vlgmr.msra.gmra.mrb[12].mxu1 %vm192_vm1, %v834_v13 }
 0x107   : > { %818 = vmatmul.mubr.msk.bf16.vlgmr.msra.gmra.mrb[16].mxu0 %vm192_vm1, %v834_v13 }
 0x1c0   : > { %v300_v26 = vpop.f32.mrb[0].mxu1 }
 0x1c1   : > { %308 = vst.msk [vmem:[%s917_s27] sm:$0xff] %vm307_vm3, %v300_v26  ;;  %v777_v27 = vpop.f32.mrb[1].mxu1 }
 0x1c2   : > { %v349_v28 = vpop.f32.mrb[4].mxu0  ;;  %v303_v29 = vpop.f32.mrb[2].mxu1 }
 0x1c3   : > { %725 = vst.msk [vmem:[%s917_s27 + $0x10] sm:$0xff] %vm307_vm3, %v349_v28  ;;  %v783_v30 = vpop.f32.mrb[5].mxu0  ;;  %309 = vst.msk [vmem:[%s917_s27 + $0x8] sm:$0xff] %vm307_vm3, %v303_v29  ;;  %v778_v31 = vpop.f32.mrb[3].mxu1 }
 0x1c4   : > { %v352_v32 = vpop.f32.mrb[6].mxu0 }
 0x1c5   : > { %726 = vst.msk [vmem:[%s917_s27 + $0x18] sm:$0xff] %vm307_vm3, %v352_v32  ;;  %v784_v33 = vpop.f32.mrb[7].mxu0 }
 0x1c8   : > { %v397_v34 = vpop.f32.mrb[4].mxu1 }
 0x1c9   : > { %728 = vst.msk [vmem:[%s917_s27 + $0x20] sm:$0xff] %vm307_vm3, %v397_v34  ;;  %v789_v35 = vpop.f32.mrb[5].mxu1 }
 0x1ca   : > { %v446_v36 = vpop.f32.mrb[8].mxu0  ;;  %v400_v37 = vpop.f32.mrb[6].mxu1 }
 0x1cb   : > { %731 = vst.msk [vmem:[%s917_s27 + $0x30] sm:$0xff] %vm307_vm3, %v446_v36  ;;  %v795_v38 = vpop.f32.mrb[9].mxu0  ;;  %729 = vst.msk [vmem:[%s917_s27 + $0x28] sm:$0xff] %vm307_vm3, %v400_v37  ;;  %v790_v39 = vpop.f32.mrb[7].mxu1 }
 0x1cc   : > { %v449_v40 = vpop.f32.mrb[10].mxu0 }
 0x1cd   : > { %732 = vst.msk [vmem:[%s917_s27 + $0x38] sm:$0xff] %vm307_vm3, %v449_v40  ;;  %v796_v41 = vpop.f32.mrb[11].mxu0 }
 0x1d0   : > { %v494_v42 = vpop.f32.mrb[8].mxu1 }
 0x1d1   : > { %734 = vst.msk [vmem:[%s917_s27 + $0x40] sm:$0xff] %vm307_vm3, %v494_v42  ;;  %v801_v43 = vpop.f32.mrb[9].mxu1 }
 0x1d2   : > { %v543_v44 = vpop.f32.mrb[12].mxu0  ;;  %v497_v45 = vpop.f32.mrb[10].mxu1 }
 0x1d3   : > { %737 = vst.msk [vmem:[%s917_s27 + $0x50] sm:$0xff] %vm307_vm3, %v543_v44  ;;  %v807_v46 = vpop.f32.mrb[13].mxu0  ;;  %735 = vst.msk [vmem:[%s917_s27 + $0x48] sm:$0xff] %vm307_vm3, %v497_v45  ;;  %v802_v47 = vpop.f32.mrb[11].mxu1 }
 0x1d4   : > { %v546_v48 = vpop.f32.mrb[14].mxu0 }
 0x1d5   : > { %738 = vst.msk [vmem:[%s917_s27 + $0x58] sm:$0xff] %vm307_vm3, %v546_v48  ;;  %v808_v49 = vpop.f32.mrb[15].mxu0 }
 0x1d8   : > { %v591_v50 = vpop.f32.mrb[12].mxu1 }
 0x1d9   : > { %740 = vst.msk [vmem:[%s917_s27 + $0x60] sm:$0xff] %vm307_vm3, %v591_v50  ;;  %v813_v51 = vpop.f32.mrb[13].mxu1 }
 0x1da   : > { %v640_v52 = vpop.f32.mrb[16].mxu0  ;;  %v594_v53 = vpop.f32.mrb[14].mxu1 }
 0x1db   : > { %743 = vst.msk [vmem:[%s917_s27 + $0x70] sm:$0xff] %vm307_vm3, %v640_v52  ;;  %v819_v54 = vpop.f32.mrb[17].mxu0  ;;  %741 = vst.msk [vmem:[%s917_s27 + $0x68] sm:$0xff] %vm307_vm3, %v594_v53  ;;  %v814_v55 = vpop.f32.mrb[15].mxu1 }
 0x1dc   : > { %v643_v56 = vpop.f32.mrb[18].mxu0 }
 0x1dd   : > { %744 = vst.msk [vmem:[%s917_s27 + $0x78] sm:$0xff] %vm307_vm3, %v643_v56  ;;  %v820_v57 = vpop.f32.mrb[19].mxu0 }
 0x1de PF: > { %s13_s12 = sadd.s32 1, %s841_s12  }
 0x1df   : > { %p10_p5 = scmp.ge.s32.totalorder %s13_s12, 7  }
 0x1e1   :  { %12 = sbr.rel (!%p10_p5) target bundleno = 1 (0x1), region = 69 }

// kernel: augmented_conv_forward.4
= control target key start
LH: loop header
LB: loop body
LE: loop exit
PB: predicated region body
PF: predicated region fallthrough
CT: control target
= control target key end

     0   :  { %vm262_vm0 = vcmask 1045504   ;;  %vm77_vm1 = vcmask 1041408   ;;  %vm2400_vm2 = vmmov 1   ;;  %vm70_vm4 = vcmask 80896   ;;  %s2709_s0 = inlined_call_operand.vmem [shape: f32[2,84,16], index: 0, kind: input, shape index: {}]   ;;  %s2710_s1 = inlined_call_operand.vmem [shape: f32[4,4], index: 1, kind: input, shape index: {}]   ;;  %s2711_s2 = inlined_call_operand.vmem [shape: f32[4,1], index: 2, kind: input, shape index: {}]   ;;  %s2712_s3 = inlined_call_operand.vmem [shape: f32[2,4,16], index: 3, kind: output, shape index: {}]  }
   0x1   :  { %v14_v0 = vld [vmem:[%s2709_s0] sm:$0xff]  ;;  %v15_v1 = vld [vmem:[%s2709_s0 + $0x8] sm:$0xff]  ;;  %v2434_v2 = vld [vmem:[%s2709_s0 + $0x10] sm:$0xff]  ;;  %vm156_vm5 = vcmask 130048   ;;  %v2401_v47 = vmov 0.0|0.0   ;;  %vm2402_vm6 = vmmov 0  }
   0x2   :  { %38 = vxpose.xlu0.b32.start [1/2] (short) (narrow) %v14_v0, 16  ;;  %v263_v3 = vrot.slane %v15_v1, 2  ;;  %v264_v4 = vrot.slane %v2434_v2, 2  ;;  %v19_v5 = vld [vmem:[%s2709_s0 + $0x28] sm:$0xff]  ;;  %v20_v6 = vld [vmem:[%s2709_s0 + $0x30] sm:$0xff]  ;;  %v2446_v7 = vld [vmem:[%s2709_s0 + $0x38] sm:$0xff]  ;;  %2256 = vmatprep.subr.bf16.mxu1 %v2401_v47 }
   0x3   :  { %vm2449_vm3 = vmpackc.low %vm77_vm1, %vm2400_vm2  ;;  %v2250_v10 = vpack.c.bf16 %v20_v6, %v19_v5  ;;  %v301_v11 = vrot.slane %v20_v6, 2  ;;  %v302_v12 = vrot.slane %v2446_v7, 2  ;;  %v2403_v48 = vmov 0.0   ;;  %v17_v49 = vld [vmem:[%s2709_s0 + $0x18] sm:$0xff]  ;;  %v18_v53 = vld [vmem:[%s2709_s0 + $0x20] sm:$0xff] }
   0x4   :  { %v265_v9 = vsel %vm262_vm0, %v263_v3, %v264_v4  ;;  %2139 = vmatprep.mubr.msk.f32.mxu1 %vm2402_vm6, %v2403_v48  ;;  %v492_v50 = vrot.slane %v2434_v2, 4  ;;  %v493_v51 = vrot.slane %v17_v49, 4  ;;  %vm491_vm7 = vcmask 1043456   ;;  %v22_v59 = vld [vmem:[%s2709_s0 + $0x40] sm:$0xff]  ;;  %vm2501_vm8 = vmpackc.low %vm156_vm5, %vm156_vm5 }
   0x5   :  { %268 = vxpose.xlu1.b32.start [1/2] (short) (narrow) %v265_v9, 16  ;;  %2252 = vmatprep.subr.msk.bf16.mxu0 %vm2449_vm3, %v2250_v10  ;;  %v303_v13 = vsel %vm262_vm0, %v301_v11, %v302_v12  ;;  %v720_v54 = vrot.slane %v17_v49, 6  ;;  %v721_v55 = vrot.slane %v18_v53, 6  ;;  %v530_v61 = vrot.slane %v2446_v7, 4 }
   0x6   :  { %39 = vxpose.xlu0.b32.end [2/2] (short) (narrow) %v15_v1, 16  ;;  %2255 = vmatpush3.bf16.msk.msra.mxu0 %vm2449_vm3, %v2250_v10  ;;  %v2260_v14 = vpack.c.bf16 %v302_v12, %v303_v13  ;;  %v494_v52 = vsel %vm491_vm7, %v492_v50, %v493_v51  ;;  %v531_v62 = vrot.slane %v22_v59, 4  ;;  %v758_v10 = vrot.slane %v22_v59, 6  ;;  %v26_v59 = vld [vmem:[%s2709_s0 + $0x60] sm:$0xff] }
   0x7   :  { %v722_v56 = vsel %vm77_vm1, %v720_v54, %v721_v55  ;;  %vm258_vm9 = vcmask 122880   ;;  %vm953_vm10 = vcmask 31744   ;;  %vm1030_vm11 = vcmask 125952  }
   0x8   :  { %2262 = vmatprep.subr.msk.bf16.mxu0 %vm2449_vm3, %v2260_v14  ;;  %v532_v1 = vsel %vm491_vm7, %v530_v61, %v531_v62  ;;  %v25_v61 = vld [vmem:[%s2709_s0 + $0x58] sm:$0xff] }
   0x9   :  { %269 = vxpose.xlu1.b32.end [2/2] (short) (narrow) %v264_v4, 16  ;;  %v23_v4 = vld [vmem:[%s2709_s0 + $0x48] sm:$0xff]  ;;  %v2270_v7 = vpack.c.bf16 %v531_v62, %v532_v1  ;;  %v1252_v62 = vrot.slane %v26_v59, 2 }
   0xa   :  { %v759_v11 = vrot.slane %v23_v4, 6 }
   0xc   :  { %v760_v13 = vsel %vm77_vm1, %v758_v10, %v759_v11 }
  0x82   :  { %v54_v15 = vpop.trf.xlu0 }
  0x83   :  { %2132 = vmatprep.mubr.msk.f32.mxu0 %vm70_vm4, %v54_v15 }
  0x85   :  { %v284_v16 = vpop.trf.xlu1 }
  0x86   :  { %v55_v17 = vpop.trf.xlu0 }
  0x87   :  { %2133 = vmatmul.mubr.msk.f32.vlgmr.msra.gmra.mrb[0].mxu0 %vm70_vm4, %v55_v17  ;;  %v2513_v17 = vld [vmem:[%s2709_s0 + $0x50] sm:$0xf] }
  0x88   :  { %2265 = vmatpush3.bf16.msk.msra.mxu0 %vm2449_vm3, %v2260_v14  ;;  %2146 = vmatprep.mubr.msk.f32.mxu0 %vm70_vm4, %v284_v16 }
  0x89   :  { %v285_v18 = vpop.trf.xlu1  ;;  %2266 = vmatprep.subr.bf16.mxu0 %v2401_v47 }
  0x8b   :  { %2147 = vmatmul.mubr.msk.f32.vlgmr.msra.gmra.mrb[2].mxu0 %vm70_vm4, %v285_v18  ;;  %v2280_v18 = vpack.c.bf16 %v759_v11, %v760_v13 }
  0x8c   :  { %2153 = vmatprep.mubr.msk.f32.mxu0 %vm2402_vm6, %v2403_v48 }
 0x15a   :  { %v2134_v19 = vpop.f32.mrb[0].mxu0 }
 0x15b   :  { %v147_v20 = vpop.f32.mrb[1].mxu0  ;;  %v160_v21 = vsel %vm156_vm5, %v2134_v19, -inf }
 0x15c   :  { %161 = vmax.xlane.f32.xlu1 %v160_v21  ;;  %v157_v22 = vsel %vm156_vm5, %v147_v20, -inf }
 0x15d   :  { %158 = vmax.xlane.f32.xlu0 %v157_v22 }
 0x15e   :  { %v2148_v23 = vpop.f32.mrb[2].mxu0 }
 0x15f   :  { %v379_v24 = vpop.f32.mrb[3].mxu0  ;;  %v391_v26 = vsel %vm156_vm5, %v2148_v23, -inf }
 0x160   :  { %v388_v25 = vsel %vm156_vm5, %v379_v24, -inf }
 0x161   :  { %389 = vmax.xlane.f32.xlu1 %v388_v25 }
 0x165   :  { %392 = vmax.xlane.f32.xlu1 %v391_v26 }
 0x1e9   :  { %v162_v27 = vpop.xlane.xlu1 %161 }
 0x1ea   :  { %v164_v28 = vsub.f32 %v2134_v19, %v162_v27  ;;  %v159_v29 = vpop.xlane.xlu0 %158 }
 0x1eb   :  { %v163_v30 = vsub.f32 %v147_v20, %v159_v29  ;;  %v410_v20 = vrot.slane %v2513_v17, 1 }
 0x1ec   :  { %v167_v31 = vmul.f32 1.442695, %v164_v28 }
 0x1ed   :  { %v165_v32 = vmul.f32 1.442695, %v163_v30 }
 0x1ee   :  { %2336 = vpow2.f32 %v167_v31  ;;  %v390_v33 = vpop.xlane.xlu1 %389 }
 0x1ef   :  { %2338 = vpow2.f32 %v165_v32  ;;  %v394_v34 = vsub.f32 %v379_v24, %v390_v33 }
 0x1f1   :  { %v396_v35 = vmul.f32 1.442695, %v394_v34 }
 0x1f2   :  { %v393_v36 = vpop.xlane.xlu1 %392 }
 0x1f3   :  { %2340 = vpow2.f32 %v396_v35  ;;  %v395_v37 = vsub.f32 %v2148_v23, %v393_v36 }
 0x1f5   :  { %v398_v38 = vmul.f32 1.442695, %v395_v37 }
 0x1f7   :  { %2342 = vpow2.f32 %v398_v38 }
 0x1f8   :  { %v2337_v39 = vpop.eup %2336 }
 0x1f9   :  { %v2339_v40 = vpop.eup %2338  ;;  %v172_v41 = vsel %vm156_vm5, %v2337_v39, 0.0 }
 0x1fa   :  { %173 = vadd.xlane.f32.xlu1 %v172_v41  ;;  %v169_v42 = vsel %vm156_vm5, %v2339_v40, 0.0 }
 0x1fb   :  { %170 = vadd.xlane.f32.xlu0 %v169_v42 }
 0x1fd   :  { %v2341_v43 = vpop.eup %2340 }
 0x1fe   :  { %v400_v44 = vsel %vm156_vm5, %v2341_v43, 0.0 }
 0x1ff   :  { %401 = vadd.xlane.f32.xlu0 %v400_v44 }
 0x201   :  { %v2343_v45 = vpop.eup %2342 }
 0x202   :  { %v403_v46 = vsel %vm156_vm5, %v2343_v45, 0.0 }
 0x203   :  { %404 = vadd.xlane.f32.xlu1 %v403_v46 }
 0x22c   :  { %497 = vxpose.xlu0.b32.start [1/2] (short) (narrow) %v494_v52, 16 }
 0x230   :  { %498 = vxpose.xlu0.b32.end [2/2] (short) (narrow) %v493_v51, 16 }
 0x236   :  { %725 = vxpose.xlu1.b32.start [1/2] (short) (narrow) %v722_v56, 16 }
 0x23a   :  { %726 = vxpose.xlu1.b32.end [2/2] (short) (narrow) %v721_v55, 16 }
 0x287   :  { %v174_v57 = vpop.xlane.xlu1 %173 }
 0x288   :  { %2344 = vrcp.f32 %v174_v57  ;;  %v171_v58 = vpop.xlane.xlu0 %170 }
 0x289   :  { %2346 = vrcp.f32 %v171_v58 }
 0x28c   :  { %v402_v60 = vpop.xlane.xlu0 %401 }
 0x28d   :  { %2348 = vrcp.f32 %v402_v60  ;;  %v2553_v60 = vld [vmem:[%s2709_s0 + $0x68] sm:$0xff] }
 0x290   :  { %v405_v63 = vpop.xlane.xlu1 %404 }
 0x291   :  { %2350 = vrcp.f32 %v405_v63  ;;  %v1253_v63 = vrot.slane %v2553_v60, 2 }
 0x292   :  { %v2345_v0 = vpop.eup %2344 }
 0x293   :  { %v2347_v2 = vpop.eup %2346  ;;  %v178_v3 = vmul.f32 %v2345_v0, %v2337_v39  ;;  %v1254_v0 = vsel %vm262_vm0, %v1252_v62, %v1253_v63 }
 0x294   :  { %v177_v5 = vmul.f32 %v2347_v2, %v2339_v40 }
 0x296   :  { %v2257_v9 = vpack.c.bf16 %v178_v3, %v177_v5 }
 0x297   :  { %v2349_v12 = vpop.eup %2348 }
 0x298   :  { %2259 = vmatpush3.bf16.xpose.msk.msra.mxu1 %vm2501_vm8, %v2257_v9  ;;  %v408_v15 = vmul.f32 %v2349_v12, %v2341_v43  ;;  %v639_v12 = vrot.slane %v2513_v17, 2 }
 0x299   :  { %2272 = vmatprep.subr.msk.bf16.mxu1 %vm2449_vm3, %v2270_v7 }
 0x29b   :  { %v2351_v14 = vpop.eup %2350 }
 0x29c   :  { %v409_v16 = vmul.f32 %v2351_v14, %v2343_v45 }
 0x29e   :  { %v2267_v19 = vpack.c.bf16 %v409_v16, %v408_v15 }
 0x29f   :  { %2140 = vmatmul.mubr.msk.f32.vlgmr.msra.gmra.mrb[0].mxu1 %vm156_vm5, %v2513_v17 }
 0x2a0   :  { %2269 = vmatpush3.bf16.xpose.msk.msra.mxu0 %vm2501_vm8, %v2267_v19  ;;  %2275 = vmatpush3.bf16.msk.msra.mxu1 %vm2449_vm3, %v2270_v7  ;;  %v867_v19 = vrot.slane %v2513_v17, 3 }
 0x2a1   :  { %2282 = vmatprep.subr.msk.bf16.mxu0 %vm2449_vm3, %v2280_v18  ;;  %2276 = vmatprep.subr.bf16.mxu1 %v2401_v47 }
 0x2a7   :  { %2154 = vmatmul.mubr.msk.f32.vlgmr.msra.gmra.mrb[4].mxu0 %vm156_vm5, %v410_v20 }
 0x2a8   :  { %2285 = vmatpush3.bf16.msk.msra.mxu0 %vm2449_vm3, %v2280_v18 }
 0x2a9   :  { %2286 = vmatprep.subr.bf16.mxu0 %v2401_v47 }
 0x2ac   :  { %v513_v21 = vpop.trf.xlu0 }
 0x2ad   :  { %2160 = vmatprep.mubr.msk.f32.mxu1 %vm70_vm4, %v513_v21 }
 0x2b0   :  { %v514_v22 = vpop.trf.xlu0 }
 0x2b1   :  { %2161 = vmatmul.mubr.msk.f32.vlgmr.msra.gmra.mrb[2].mxu1 %vm70_vm4, %v514_v22  ;;  %v31_v22 = vld [vmem:[%s2709_s0 + $0x88] sm:$0xff] }
 0x2b2   :  { %2167 = vmatprep.mubr.msk.f32.mxu1 %vm2402_vm6, %v2403_v48  ;;  %v1290_v17 = vrot.slane %v31_v22, 2 }
 0x2b6   :  { %v741_v23 = vpop.trf.xlu1 }
 0x2b7   :  { %2174 = vmatprep.mubr.msk.f32.mxu0 %vm70_vm4, %v741_v23  ;;  %v2581_v23 = vld [vmem:[%s2709_s0 + $0x90] sm:$0xff] }
 0x2ba   :  { %v742_v24 = vpop.trf.xlu1 }
 0x2bb   :  { %2175 = vmatmul.mubr.msk.f32.vlgmr.msra.gmra.mrb[6].mxu0 %vm70_vm4, %v742_v24 }
 0x2bc   :  { %2181 = vmatprep.mubr.msk.f32.mxu0 %vm2402_vm6, %v2403_v48 }
 0x372   :  { %v254_v25 = vpop.f32.mrb[0].mxu1 }
 0x373   :  { %259 = vst.msk [vmem:[#allocation2] sm:$0x1] %vm258_vm9, %v254_v25  ;;  %v2141_v26 = vpop.f32.mrb[1].mxu1  ;;  %v1291_v25 = vrot.slane %v2581_v23, 2 }
 0x37a   :  { %v485_v27 = vpop.f32.mrb[4].mxu0 }
 0x37b   :  { %489 = vst.msk [vmem:[#allocation2 + $0x1] sm:$0x1] %vm258_vm9, %v485_v27  ;;  %v2155_v28 = vpop.f32.mrb[5].mxu0  ;;  %v30_v27 = vld [vmem:[%s2709_s0 + $0x80] sm:$0xff] }
 0x37c   :  { %v1292_v28 = vsel %vm262_vm0, %v1290_v17, %v1291_v25 }
 0x384   :  { %v2162_v29 = vpop.f32.mrb[2].mxu1 }
 0x385   :  { %v608_v30 = vpop.f32.mrb[3].mxu1  ;;  %v620_v31 = vsel %vm156_vm5, %v2162_v29, -inf }
 0x386   :  { %621 = vmax.xlane.f32.xlu1 %v620_v31  ;;  %v617_v32 = vsel %vm156_vm5, %v608_v30, -inf  ;;  %v2592_v31 = vld [vmem:[%s2710_s1] sm:$0xf] }
 0x387   :  { %618 = vmax.xlane.f32.xlu0 %v617_v32 }
 0x38e   :  { %v2176_v33 = vpop.f32.mrb[6].mxu0 }
 0x38f   :  { %v836_v34 = vpop.f32.mrb[7].mxu0  ;;  %v848_v35 = vsel %vm156_vm5, %v2176_v33, -inf }
 0x390   :  { %849 = vmax.xlane.f32.xlu1 %v848_v35  ;;  %v845_v36 = vsel %vm156_vm5, %v836_v34, -inf }
 0x391   :  { %846 = vmax.xlane.f32.xlu0 %v845_v36 }
 0x413   :  { %v622_v37 = vpop.xlane.xlu1 %621 }
 0x414   :  { %v624_v38 = vsub.f32 %v2162_v29, %v622_v37  ;;  %v619_v39 = vpop.xlane.xlu0 %618 }
 0x415   :  { %v623_v40 = vsub.f32 %v608_v30, %v619_v39  ;;  %v2290_v30 = vpack.c.bf16 %v31_v22, %v30_v27 }
 0x416   :  { %v627_v41 = vmul.f32 1.442695, %v624_v38 }
 0x417   :  { %v625_v42 = vmul.f32 1.442695, %v623_v40 }
 0x418   :  { %2352 = vpow2.f32 %v627_v41 }
 0x419   :  { %2354 = vpow2.f32 %v625_v42 }
 0x41d   :  { %v850_v43 = vpop.xlane.xlu1 %849 }
 0x41e   :  { %v852_v44 = vsub.f32 %v2176_v33, %v850_v43  ;;  %v847_v45 = vpop.xlane.xlu0 %846  ;;  %v2300_v33 = vpack.c.bf16 %v1291_v25, %v1292_v28 }
 0x41f   :  { %v851_v46 = vsub.f32 %v836_v34, %v847_v45 }
 0x420   :  { %v855_v49 = vmul.f32 1.442695, %v852_v44 }
 0x421   :  { %v853_v50 = vmul.f32 1.442695, %v851_v46 }
 0x422   :  { %v2353_v51 = vpop.eup %2352  ;;  %2356 = vpow2.f32 %v855_v49 }
 0x423   :  { %v2355_v52 = vpop.eup %2354  ;;  %2358 = vpow2.f32 %v853_v50  ;;  %v632_v53 = vsel %vm156_vm5, %v2353_v51, 0.0 }
 0x424   :  { %633 = vadd.xlane.f32.xlu1 %v632_v53  ;;  %v629_v54 = vsel %vm156_vm5, %v2355_v52, 0.0 }
 0x425   :  { %630 = vadd.xlane.f32.xlu0 %v629_v54 }
 0x42c   :  { %v2357_v55 = vpop.eup %2356 }
 0x42d   :  { %v2359_v56 = vpop.eup %2358  ;;  %v860_v57 = vsel %vm156_vm5, %v2357_v55, 0.0 }
 0x42e   :  { %861 = vadd.xlane.f32.xlu1 %v860_v57  ;;  %v857_v58 = vsel %vm156_vm5, %v2359_v56, 0.0 }
 0x42f   :  { %858 = vadd.xlane.f32.xlu0 %v857_v58 }
 0x45c   :  { %1032 = vxpose.xlu0.b32.start [1/2] (short) (narrow) %v25_v61, 16 }
 0x460   :  { %1033 = vxpose.xlu0.b32.end [2/2] (short) (narrow) %v26_v59, 16 }
 0x461   :  { %1257 = vxpose.xlu1.b32.start [1/2] (short) (narrow) %v1254_v0, 16 }
 0x465   :  { %1258 = vxpose.xlu1.b32.end [2/2] (short) (narrow) %v1253_v63, 16 }
 0x4b1   :  { %v634_v1 = vpop.xlane.xlu1 %633 }
 0x4b2   :  { %2360 = vrcp.f32 %v634_v1  ;;  %v631_v2 = vpop.xlane.xlu0 %630 }
 0x4b3   :  { %2362 = vrcp.f32 %v631_v2 }
 0x4bb   :  { %v862_v3 = vpop.xlane.xlu1 %861 }
 0x4bc   :  { %v2361_v4 = vpop.eup %2360  ;;  %2364 = vrcp.f32 %v862_v3  ;;  %v859_v5 = vpop.xlane.xlu0 %858 }
 0x4bd   :  { %v2363_v7 = vpop.eup %2362  ;;  %v638_v9 = vmul.f32 %v2361_v4, %v2353_v51  ;;  %2366 = vrcp.f32 %v859_v5 }
 0x4be   :  { %v637_v10 = vmul.f32 %v2363_v7, %v2355_v52  ;;  %v28_v7 = vld [vmem:[%s2709_s0 + $0x70] sm:$0xff] }
 0x4c0   :  { %v2277_v11 = vpack.c.bf16 %v638_v9, %v637_v10  ;;  %v1480_v9 = vrot.slane %v2553_v60, 4  ;;  %v1481_v10 = vrot.slane %v28_v7, 4 }
 0x4c2   :  { %2279 = vmatpush3.bf16.xpose.msk.msra.mxu1 %vm2501_vm8, %v2277_v11  ;;  %v29_v11 = vld [vmem:[%s2709_s0 + $0x78] sm:$0xff] }
 0x4c3   :  { %2184 = vmatprep.subr.mxu1 %v2403_v48 }
 0x4c6   :  { %v2365_v13 = vpop.eup %2364 }
 0x4c7   :  { %v2367_v14 = vpop.eup %2366  ;;  %v866_v15 = vmul.f32 %v2365_v13, %v2357_v55  ;;  %v1708_v13 = vrot.slane %v28_v7, 6 }
 0x4c8   :  { %v865_v16 = vmul.f32 %v2367_v14, %v2359_v56  ;;  %v1709_v14 = vrot.slane %v29_v11, 6 }
 0x4c9   :  { %2168 = vmatmul.mubr.msk.f32.vlgmr.msra.gmra.mrb[4].mxu1 %vm156_vm5, %v639_v12  ;;  %v1482_v12 = vsel %vm491_vm7, %v1480_v9, %v1481_v10 }
 0x4ca   :  { %v2287_v18 = vpack.c.bf16 %v866_v15, %v865_v16  ;;  %2186 = vmatprep.mubr.msk.f32.mxu1 %vm2402_vm6, %v2403_v48  ;;  %v1710_v15 = vsel %vm77_vm1, %v1708_v13, %v1709_v14 }
 0x4cc   :  { %2289 = vmatpush3.bf16.xpose.msk.msra.mxu0 %vm2501_vm8, %v2287_v18 }
 0x4cd   :  { %2296 = vmatprep.subr.bf16.mxu0 %v2401_v47 }
 0x4d3   :  { %2182 = vmatmul.mubr.msk.f32.vlgmr.msra.gmra.mrb[8].mxu0 %vm156_vm5, %v867_v19  ;;  %v33_v19 = vld [vmem:[%s2709_s0 + $0x98] sm:$0xff] }
 0x4d4   :  { %2200 = vmatprep.mubr.msk.f32.mxu0 %vm2402_vm6, %v2403_v48  ;;  %v1519_v22 = vrot.slane %v33_v19, 4 }
 0x4dc   :  { %v1048_v29 = vpop.trf.xlu0 }
 0x4e0   :  { %v1049_v35 = vpop.trf.xlu0 }
 0x4e1   :  { %v1273_v34 = vpop.trf.xlu1 }
 0x4e5   :  { %v1274_v36 = vpop.trf.xlu1 }
 0x59c   :  { %v714_v20 = vpop.f32.mrb[4].mxu1 }
 0x59d   :  { %718 = vst.msk [vmem:[#allocation2 + $0x2] sm:$0x1] %vm258_vm9, %v714_v20  ;;  %v2169_v21 = vpop.f32.mrb[5].mxu1 }
 0x59e   :  { %v1518_v21 = vrot.slane %v2581_v23, 4 }
 0x5a0   :  { %v1520_v25 = vsel %vm491_vm7, %v1518_v21, %v1519_v22 }
 0x5a6   :  { %v942_v24 = vpop.f32.mrb[8].mxu0 }
 0x5a7   :  { %946 = vst.msk [vmem:[#allocation2 + $0x3] sm:$0x1] %vm258_vm9, %v942_v24  ;;  %v2183_v26 = vpop.f32.mrb[9].mxu0  ;;  %v34_v24 = vld [vmem:[%s2709_s0 + $0xa0] sm:$0xff] }
 0x5a8   :  { %v1746_v26 = vrot.slane %v33_v19, 6  ;;  %v1747_v27 = vrot.slane %v34_v24, 6  ;;  %v37_v19 = vld [vmem:[%s2711_s2] sm:$0xf] }
 0x5ae   :  { %v947_v32 = vld [vmem:[#allocation2] sm:$0xf] }
 0x5af   :  { %2185 = vmatpush3.msk.msra.mxu1 %vm491_vm7, %v947_v32  ;;  %v2310_v32 = vpack.c.bf16 %v1519_v22, %v1520_v25 }
 0x5b0   :  { %2187 = vmatmul.mubr.msk.f32.vlgmr.msra.gmra.mrb[6].mxu1 %vm953_vm10, %v2592_v31  ;;  %2292 = vmatprep.subr.msk.bf16.mxu1 %vm2449_vm3, %v2290_v30 }
 0x5b1   :  { %2295 = vmatpush3.bf16.msk.msra.mxu1 %vm2449_vm3, %v2290_v30  ;;  %2193 = vmatprep.mubr.msk.f32.mxu1 %vm70_vm4, %v1048_v29 }
 0x5b2   :  { %2302 = vmatprep.subr.msk.bf16.mxu1 %vm2449_vm3, %v2300_v33 }
 0x5b4   :  { %2194 = vmatmul.mubr.msk.f32.vlgmr.msra.gmra.mrb[8].mxu1 %vm70_vm4, %v1049_v35  ;;  %v1748_v35 = vsel %vm77_vm1, %v1746_v26, %v1747_v27 }
 0x5b5   :  { %2305 = vmatpush3.bf16.msk.msra.mxu1 %vm2449_vm3, %v2300_v33  ;;  %2207 = vmatprep.mubr.msk.f32.mxu1 %vm70_vm4, %v1273_v34 }
 0x5b6   :  { %2306 = vmatprep.subr.bf16.mxu1 %v2401_v47 }
 0x5b8   :  { %2208 = vmatmul.mubr.msk.f32.vlgmr.msra.gmra.mrb[10].mxu1 %vm70_vm4, %v1274_v36 }
 0x5b9   :  { %2214 = vmatprep.mubr.msk.f32.mxu1 %vm2402_vm6, %v2403_v48 }
 0x683   :  { %v2612_v37 = vpop.f32.mrb[6].mxu1 }
 0x684   :  { %v2188_v38 = vpop.f32.mrb[7].mxu1 }
 0x687   :  { %v2195_v39 = vpop.f32.mrb[8].mxu1 }
 0x688   :  { %v1139_v40 = vpop.f32.mrb[9].mxu1  ;;  %v1151_v41 = vsel %vm156_vm5, %v2195_v39, -inf }
 0x689   :  { %1152 = vmax.xlane.f32.xlu1 %v1151_v41  ;;  %v1148_v42 = vsel %vm156_vm5, %v1139_v40, -inf  ;;  %v2649_v41 = vld [vmem:[%s2709_s0 + $0xa8] sm:$0xf] }
 0x68a   :  { %1149 = vmax.xlane.f32.xlu0 %v1148_v42  ;;  %v1399_v42 = vrot.slane %v2649_v41, 1 }
 0x68b   :  { %v2209_v43 = vpop.f32.mrb[10].mxu1 }
 0x68c   :  { %v1368_v44 = vpop.f32.mrb[11].mxu1  ;;  %v1380_v45 = vsel %vm156_vm5, %v2209_v43, -inf }
 0x68d   :  { %1381 = vmax.xlane.f32.xlu1 %v1380_v45  ;;  %v1377_v46 = vsel %vm156_vm5, %v1368_v44, -inf }
 0x68e   :  { %1378 = vmax.xlane.f32.xlu0 %v1377_v46 }
 0x716   :  { %v1153_v49 = vpop.xlane.xlu1 %1152 }
 0x717   :  { %v1155_v50 = vsub.f32 %v2195_v39, %v1153_v49  ;;  %v1150_v51 = vpop.xlane.xlu0 %1149  ;;  %v2320_v39 = vpack.c.bf16 %v1747_v27, %v1748_v35 }
 0x718   :  { %v1154_v52 = vsub.f32 %v1139_v40, %v1150_v51 }
 0x719   :  { %v1158_v53 = vmul.f32 1.442695, %v1155_v50 }
 0x71a   :  { %v1156_v54 = vmul.f32 1.442695, %v1154_v52  ;;  %v1382_v55 = vpop.xlane.xlu1 %1381 }
 0x71b   :  { %2368 = vpow2.f32 %v1158_v53  ;;  %v1384_v56 = vsub.f32 %v2209_v43, %v1382_v55  ;;  %v1379_v57 = vpop.xlane.xlu0 %1378 }
 0x71c   :  { %2370 = vpow2.f32 %v1156_v54  ;;  %v1383_v58 = vsub.f32 %v1368_v44, %v1379_v57 }
 0x71d   :  { %v1387_v59 = vmul.f32 1.442695, %v1384_v56 }
 0x71e   :  { %v1385_v61 = vmul.f32 1.442695, %v1383_v58 }
 0x71f   :  { %2372 = vpow2.f32 %v1387_v59  ;;  %v2404_v59 = vmov 0  }
 0x720   :  { %2374 = vpow2.f32 %v1385_v61 }
 0x725   :  { %v2369_v62 = vpop.eup %2368 }
 0x726   :  { %v2371_v63 = vpop.eup %2370  ;;  %v1163_v0 = vsel %vm156_vm5, %v2369_v62, 0.0 }
 0x727   :  { %1164 = vadd.xlane.f32.xlu1 %v1163_v0  ;;  %v1160_v1 = vsel %vm156_vm5, %v2371_v63, 0.0 }
 0x728   :  { %1161 = vadd.xlane.f32.xlu0 %v1160_v1 }
 0x729   :  { %v2373_v2 = vpop.eup %2372 }
 0x72a   :  { %v2375_v3 = vpop.eup %2374  ;;  %v1392_v4 = vsel %vm156_vm5, %v2373_v2, 0.0 }
 0x72b   :  { %1393 = vadd.xlane.f32.xlu1 %v1392_v4  ;;  %v1389_v5 = vsel %vm156_vm5, %v2375_v3, 0.0 }
 0x72c   :  { %1390 = vadd.xlane.f32.xlu0 %v1389_v5 }
 0x759   :  { %1485 = vxpose.xlu0.b32.start [1/2] (short) (narrow) %v1482_v12, 16 }
 0x75d   :  { %1486 = vxpose.xlu0.b32.end [2/2] (short) (narrow) %v1481_v10, 16 }
 0x75e   :  { %1713 = vxpose.xlu1.b32.start [1/2] (short) (narrow) %v1710_v15, 16 }
 0x762   :  { %1714 = vxpose.xlu1.b32.end [2/2] (short) (narrow) %v1709_v14, 16 }
 0x786   :  { %2335 = vset.pattern.permute.xlu0 %v2404_v59 }
 0x7b4   :  { %v1165_v16 = vpop.xlane.xlu1 %1164 }
 0x7b5   :  { %2376 = vrcp.f32 %v1165_v16  ;;  %v1162_v18 = vpop.xlane.xlu0 %1161 }
 0x7b6   :  { %2378 = vrcp.f32 %v1162_v18 }
 0x7b8   :  { %v1394_v60 = vpop.xlane.xlu1 %1393 }
 0x7b9   :  { %2380 = vrcp.f32 %v1394_v60  ;;  %v1391_v20 = vpop.xlane.xlu0 %1390 }
 0x7ba   :  { %2382 = vrcp.f32 %v1391_v20 }
 0x7bf   :  { %v2377_v17 = vpop.eup %2376 }
 0x7c0   :  { %v2379_v28 = vpop.eup %2378  ;;  %v1169_v29 = vmul.f32 %v2377_v17, %v2369_v62 }
 0x7c1   :  { %v1168_v30 = vmul.f32 %v2379_v28, %v2371_v63 }
 0x7c3   :  { %v2381_v33 = vpop.eup %2380  ;;  %v2297_v34 = vpack.c.bf16 %v1169_v29, %v1168_v30 }
 0x7c4   :  { %v2383_v36 = vpop.eup %2382  ;;  %v1398_v23 = vmul.f32 %v2381_v33, %v2373_v2 }
 0x7c5   :  { %v1397_v38 = vmul.f32 %v2383_v36, %v2375_v3  ;;  %2299 = vmatpush3.bf16.xpose.msk.msra.mxu0 %vm2501_vm8, %v2297_v34  ;;  %v1627_v36 = vrot.slane %v2649_v41, 2 }
 0x7c6   :  { %2312 = vmatprep.subr.msk.bf16.mxu0 %vm2449_vm3, %v2310_v32 }
 0x7c7   :  { %v2307_v40 = vpack.c.bf16 %v1398_v23, %v1397_v38 }
 0x7c9   :  { %2309 = vmatpush3.bf16.xpose.msk.msra.mxu1 %vm2501_vm8, %v2307_v40 }
 0x7ca   :  { %2322 = vmatprep.subr.msk.bf16.mxu1 %vm2449_vm3, %v2320_v39 }
 0x7cc   :  { %2201 = vmatmul.mubr.msk.f32.vlgmr.msra.gmra.mrb[10].mxu0 %vm156_vm5, %v2649_v41 }
 0x7cd   :  { %2315 = vmatpush3.bf16.msk.msra.mxu0 %vm2449_vm3, %v2310_v32 }
 0x7ce   :  { %2316 = vmatprep.subr.bf16.mxu0 %v2401_v47 }
 0x7d0   :  { %2215 = vmatmul.mubr.msk.f32.vlgmr.msra.gmra.mrb[12].mxu1 %vm156_vm5, %v1399_v42 }
 0x7d1   :  { %2325 = vmatpush3.bf16.msk.msra.mxu1 %vm2449_vm3, %v2320_v39 }
 0x7d2   :  { %2326 = vmatprep.subr.bf16.mxu1 %v2401_v47 }
 0x7d9   :  { %v1501_v43 = vpop.trf.xlu0 }
 0x7da   :  { %2221 = vmatprep.mubr.msk.f32.mxu0 %vm70_vm4, %v1501_v43 }
 0x7dd   :  { %v1502_v44 = vpop.trf.xlu0 }
 0x7de   :  { %v1729_v45 = vpop.trf.xlu1  ;;  %2222 = vmatmul.mubr.msk.f32.vlgmr.msra.gmra.mrb[12].mxu0 %vm70_vm4, %v1502_v44 }
 0x7df   :  { %2235 = vmatprep.mubr.msk.f32.mxu1 %vm70_vm4, %v1729_v45  ;;  %2228 = vmatprep.mubr.msk.f32.mxu0 %vm2402_vm6, %v2403_v48 }
 0x7e2   :  { %v1730_v46 = vpop.trf.xlu1 }
 0x7e3   :  { %2236 = vmatmul.mubr.msk.f32.vlgmr.msra.gmra.mrb[14].mxu1 %vm70_vm4, %v1730_v46 }
 0x7e4   :  { %2242 = vmatprep.mubr.msk.f32.mxu1 %vm2402_vm6, %v2403_v48 }
 0x89f   :  { %v1245_v8 = vpop.f32.mrb[10].mxu0 }
 0x8a0   :  { %1249 = vst.msk [vmem:[#allocation2] sm:$0x1] %vm258_vm9, %v1245_v8  ;;  %v2202_v47 = vpop.f32.mrb[11].mxu0 }
 0x8a3   :  { %v1474_v49 = vpop.f32.mrb[12].mxu1 }
 0x8a4   :  { %1478 = vst.msk [vmem:[#allocation2 + $0x1] sm:$0x1] %vm258_vm9, %v1474_v49  ;;  %v2216_v50 = vpop.f32.mrb[13].mxu1 }
 0x8b1   :  { %v2223_v51 = vpop.f32.mrb[12].mxu0 }
 0x8b2   :  { %v1596_v52 = vpop.f32.mrb[13].mxu0  ;;  %v1608_v53 = vsel %vm156_vm5, %v2223_v51, -inf }
 0x8b3   :  { %1609 = vmax.xlane.f32.xlu1 %v1608_v53  ;;  %v1605_v54 = vsel %vm156_vm5, %v1596_v52, -inf }
 0x8b4   :  { %1606 = vmax.xlane.f32.xlu0 %v1605_v54 }
 0x8b6   :  { %v2237_v55 = vpop.f32.mrb[14].mxu1 }
 0x8b7   :  { %v1824_v56 = vpop.f32.mrb[15].mxu1  ;;  %v1836_v57 = vsel %vm156_vm5, %v2237_v55, -inf }
 0x8b8   :  { %1837 = vmax.xlane.f32.xlu1 %v1836_v57  ;;  %v1833_v58 = vsel %vm156_vm5, %v1824_v56, -inf }
 0x8b9   :  { %1834 = vmax.xlane.f32.xlu0 %v1833_v58 }
 0x940   :  { %v1610_v61 = vpop.xlane.xlu1 %1609 }
 0x941   :  { %v1612_v62 = vsub.f32 %v2223_v51, %v1610_v61  ;;  %v1607_v63 = vpop.xlane.xlu0 %1606 }
 0x942   :  { %v1611_v0 = vsub.f32 %v1596_v52, %v1607_v63 }
 0x943   :  { %v1615_v1 = vmul.f32 1.442695, %v1612_v62 }
 0x944   :  { %v1613_v2 = vmul.f32 1.442695, %v1611_v0 }
 0x945   :  { %2384 = vpow2.f32 %v1615_v1  ;;  %v1838_v3 = vpop.xlane.xlu1 %1837 }
 0x946   :  { %2386 = vpow2.f32 %v1613_v2  ;;  %v1840_v4 = vsub.f32 %v2237_v55, %v1838_v3  ;;  %v1835_v5 = vpop.xlane.xlu0 %1834 }
 0x947   :  { %v1839_v7 = vsub.f32 %v1824_v56, %v1835_v5 }
 0x948   :  { %v1843_v9 = vmul.f32 1.442695, %v1840_v4 }
 0x949   :  { %v1841_v10 = vmul.f32 1.442695, %v1839_v7 }
 0x94a   :  { %2388 = vpow2.f32 %v1843_v9 }
 0x94b   :  { %2390 = vpow2.f32 %v1841_v10 }
 0x94f   :  { %v2385_v11 = vpop.eup %2384 }
 0x950   :  { %v2387_v12 = vpop.eup %2386  ;;  %v1620_v13 = vsel %vm156_vm5, %v2385_v11, 0.0 }
 0x951   :  { %1621 = vadd.xlane.f32.xlu1 %v1620_v13  ;;  %v1617_v14 = vsel %vm156_vm5, %v2387_v12, 0.0 }
 0x952   :  { %1618 = vadd.xlane.f32.xlu0 %v1617_v14 }
 0x954   :  { %v2389_v15 = vpop.eup %2388 }
 0x955   :  { %v2391_v16 = vpop.eup %2390  ;;  %v1848_v18 = vsel %vm156_vm5, %v2389_v15, 0.0 }
 0x956   :  { %1849 = vadd.xlane.f32.xlu1 %v1848_v18  ;;  %v1845_v60 = vsel %vm156_vm5, %v2391_v16, 0.0 }
 0x957   :  { %1846 = vadd.xlane.f32.xlu0 %v1845_v60 }
 0x96d   :  { %950 = vperm.xlu0 %2335, %v37_v19  }
 0x9de   :  { %v1622_v20 = vpop.xlane.xlu1 %1621 }
 0x9df   :  { %2392 = vrcp.f32 %v1622_v20  ;;  %v1619_v21 = vpop.xlane.xlu0 %1618 }
 0x9e0   :  { %2394 = vrcp.f32 %v1619_v21 }
 0x9e3   :  { %v1850_v22 = vpop.xlane.xlu1 %1849 }
 0x9e4   :  { %2396 = vrcp.f32 %v1850_v22  ;;  %v1847_v24 = vpop.xlane.xlu0 %1846 }
 0x9e5   :  { %2398 = vrcp.f32 %v1847_v24 }
 0x9e9   :  { %v2393_v17 = vpop.eup %2392 }
 0x9ea   :  { %v2395_v25 = vpop.eup %2394  ;;  %v1626_v26 = vmul.f32 %v2393_v17, %v2385_v11 }
 0x9eb   :  { %v1625_v27 = vmul.f32 %v2395_v25, %v2387_v12 }
 0x9ec   :  { %v951_v28 = vpop.permute.xlu0 %950 }
 0x9ed   :  { %v1027_v29 = vadd.f32 %v2612_v37, %v951_v28  ;;  %v2317_v30 = vpack.c.bf16 %v1626_v26, %v1625_v27  ;;  %v1855_v37 = vrot.slane %v2649_v41, 3 }
 0x9ee   :  { %v2397_v32 = vpop.eup %2396 }
 0x9ef   :  { %v2399_v33 = vpop.eup %2398  ;;  %v1854_v34 = vmul.f32 %v2397_v32, %v2389_v15  ;;  %1031 = vst.msk [vmem:[%s2712_s3] sm:$0xf] %vm1030_vm11, %v1027_v29  ;;  %2319 = vmatpush3.bf16.xpose.msk.msra.mxu0 %vm2501_vm8, %v2317_v30 }
 0x9f0   :  { %v1853_v35 = vmul.f32 %v2399_v33, %v2391_v16  ;;  %2245 = vmatprep.subr.mxu0 %v2403_v48 }
 0x9f2   :  { %v2327_v23 = vpack.c.bf16 %v1854_v34, %v1853_v35 }
 0x9f4   :  { %2329 = vmatpush3.bf16.xpose.msk.msra.mxu1 %vm2501_vm8, %v2327_v23 }
 0x9f6   :  { %2229 = vmatmul.mubr.msk.f32.vlgmr.msra.gmra.mrb[14].mxu0 %vm156_vm5, %v1627_v36 }
 0x9f7   :  { %2247 = vmatprep.mubr.msk.f32.mxu0 %vm2402_vm6, %v2403_v48 }
 0x9fb   :  { %2243 = vmatmul.mubr.msk.f32.vlgmr.msra.gmra.mrb[16].mxu1 %vm156_vm5, %v1855_v37 }
 0xac9   :  { %v1702_v38 = vpop.f32.mrb[14].mxu0 }
 0xaca   :  { %1706 = vst.msk [vmem:[#allocation2 + $0x2] sm:$0x1] %vm258_vm9, %v1702_v38  ;;  %v2230_v39 = vpop.f32.mrb[15].mxu0 }
 0xace   :  { %v1930_v40 = vpop.f32.mrb[16].mxu1 }
 0xacf   :  { %1934 = vst.msk [vmem:[#allocation2 + $0x3] sm:$0x1] %vm258_vm9, %v1930_v40  ;;  %v2244_v42 = vpop.f32.mrb[17].mxu1 }
 0xad6   :  { %v1935_v43 = vld [vmem:[#allocation2] sm:$0xf] }
 0xad7   :  { %2246 = vmatpush3.msk.msra.mxu0 %vm491_vm7, %v1935_v43 }
 0xad8   :  { %2248 = vmatmul.mubr.msk.f32.vlgmr.msra.gmra.mrb[16].mxu0 %vm953_vm10, %v2592_v31 }
 0xbab   :  { %v2005_v6 = vpop.f32.mrb[16].mxu0 }
 0xbac   :  { %v2006_v41 = vadd.f32 %v2005_v6, %v951_v28  ;;  %v2249_v44 = vpop.f32.mrb[17].mxu0 }
 0xbae   :  { %2067 = vst.msk [vmem:[%s2712_s3 + $0x4] sm:$0xf] %vm1030_vm11, %v2006_v41 }

</bundles_post_ra>
